<compile_context>
chip_gen: v6e
topology: v6e:2x2x1
jax: 0.10.0
libtpu: 0.0.40
codegen_flags: <defaults>
</compile_context>

<pallas_src>
import functools

import jax
import jax.numpy as jnp
from jax.experimental import pallas as pl
from jax.experimental.pallas import tpu as pltpu


def _round_up(x, m):
    return (x + m - 1) // m * m


# ---------------------------------------------------------------------------
# Fused Pallas kernel: encoder (conv+relu+pool) -> projector -> predictor
# ---------------------------------------------------------------------------
def _simsiam_kernel(patches_ref, wc_ref, bc_ref, pool_ref,
                    wp_ref, bp_ref, w1_ref, b1_ref, g_ref, beta_ref,
                    w2_ref, b2_ref, p_ref, z_ref, h_ref,
                    *, n_views, batch, n_chunks, chunk, inv_hw):
    """Whole SimSiam forward for all 2B images in one invocation.

      patches_ref: (M, K_pad)     bf16  im2col patches, M = 2B*H*W
      wc_ref:      (K_pad, F_pad) bf16  conv weight as a matmul operand
      bc_ref:      (1, F_pad)     f32   conv bias
      pool_ref:    (R, M)         bf16  block-averaging matrix (rows >= 2B are 0)
      wp/bp:                            projector Linear(F, L)
      w1/b1, g/beta, w2/b2:             predictor fc1 / BatchNorm1d / fc2
      p_ref, z_ref:(R, L_pad)     f32   predictor / projector outputs
      h_ref:       (M, F_pad)     bf16  VMEM scratch for relu(conv)
    """
    # ---- Encoder: 3x3 conv as ONE large-K matmul + bias + ReLU (chunked) --
    for c in range(n_chunks):
        rows = pl.ds(c * chunk, chunk)
        hc = jnp.dot(patches_ref[rows, :], wc_ref[...],
                     preferred_element_type=jnp.float32)
        h_ref[rows, :] = jnp.maximum(hc + bc_ref[...], 0.0).astype(jnp.bfloat16)

    # ---- Global average pooling on the MXU ---------------------------------
    pooled = jnp.dot(pool_ref[...], h_ref[...],
                     preferred_element_type=jnp.float32) * inv_hw     # (R, F_pad)

    # ---- Projector: z = y @ Wp + bp ----------------------------------------
    z = jnp.dot(pooled.astype(jnp.bfloat16), wp_ref[...],
                preferred_element_type=jnp.float32) + bp_ref[...]
    z_ref[...] = z

    # ---- Predictor: fc1 -> per-view BatchNorm1d (train stats) -> ReLU -> fc2
    h1 = jnp.dot(z.astype(jnp.bfloat16), w1_ref[...],
                 preferred_element_type=jnp.float32) + b1_ref[...]    # (R, Q_pad)
    rows_idx = jax.lax.broadcasted_iota(jnp.int32, (h1.shape[0], 1), 0)
    inv_b = 1.0 / batch
    normed = jnp.zeros_like(h1)
    for v in range(n_views):
        m = ((rows_idx >= v * batch) & (rows_idx < (v + 1) * batch))
        m = m.astype(jnp.float32)
        mu = jnp.sum(h1 * m, axis=0, keepdims=True) * inv_b
        var = jnp.sum(jnp.square(h1 - mu) * m, axis=0, keepdims=True) * inv_b
        normed = normed + m * ((h1 - mu) * jax.lax.rsqrt(var + 1e-5))
    hn = jnp.maximum(normed * g_ref[...] + beta_ref[...], 0.0)
    p_ref[...] = jnp.dot(hn.astype(jnp.bfloat16), w2_ref[...],
                         preferred_element_type=jnp.float32) + b2_ref[...]


# ---------------------------------------------------------------------------
# Wrapper: layout plumbing + one pallas_call
# ---------------------------------------------------------------------------
def simsiam_forward(x1, x2, params):
    B, C, H, W = x1.shape
    feature_dim = params["conv_w"].shape[0]
    latent_dim = params["wp"].shape[1]
    q_dim = params["w1"].shape[1]

    N = 2 * B
    hw = H * W
    M = N * hw
    K = 9 * C
    K_pad = _round_up(K, 128)
    F_pad = _round_up(feature_dim, 128)
    L_pad = _round_up(latent_dim, 128)
    Q_pad = _round_up(q_dim, 128)
    R = max(8, _round_up(N, 8))

    # --- im2col patch matrix (bf16, lane-dense K_pad=128) -------------------
    x = jnp.concatenate([x1, x2], axis=0)                       # (2B, C, H, W)
    xp = jnp.pad(jnp.transpose(x, (0, 2, 3, 1)),                # NHWC
                 ((0, 0), (1, 1), (1, 1), (0, 0)))
    taps = [xp[:, kh:kh + H, kw:kw + W, :]
            for kh in range(3) for kw in range(3)]
    patches = jnp.concatenate(taps, axis=-1).reshape(M, K)
    patches = jnp.pad(patches, ((0, 0), (0, K_pad - K))).astype(jnp.bfloat16)

    # --- conv weight as a (9*C, F) matmul operand ---------------------------
    wc = jnp.transpose(params["conv_w"], (2, 3, 1, 0)).reshape(K, feature_dim)
    wc = jnp.pad(wc, ((0, K_pad - K),
                      (0, F_pad - feature_dim))).astype(jnp.bfloat16)
    bc = jnp.pad(params["conv_b"], (0, F_pad - feature_dim))
    bc = bc.reshape(1, F_pad).astype(jnp.float32)

    # --- block-averaging pool matrix (rows >= 2B are zero) ------------------
    img_of_col = jnp.arange(M, dtype=jnp.int32) // hw
    row_ids = jnp.arange(R, dtype=jnp.int32)[:, None]
    pool = (row_ids == img_of_col[None, :]).astype(jnp.bfloat16)      # (R, M)

    def pad2(a, r, c, dtype):
        return jnp.pad(a, ((0, r - a.shape[0]), (0, c - a.shape[1]))).astype(dtype)

    wp = pad2(params["wp"], F_pad, L_pad, jnp.bfloat16)
    bp = pad2(params["bp"], 1, L_pad, jnp.float32)
    w1 = pad2(params["w1"], L_pad, Q_pad, jnp.bfloat16)
    b1 = pad2(params["b1"], 1, Q_pad, jnp.float32)
    gm = pad2(params["gamma"], 1, Q_pad, jnp.float32)
    bt = pad2(params["beta"], 1, Q_pad, jnp.float32)
    w2 = pad2(params["w2"], Q_pad, L_pad, jnp.bfloat16)
    b2 = pad2(params["b2"], 1, L_pad, jnp.float32)

    # Row-chunking of the conv matmul to bound live ranges (chunk | M).
    if hw % 8 == 0:
        chunk, n_chunks = hw, M // hw
    else:
        chunk, n_chunks = M, 1

    kern = functools.partial(_simsiam_kernel, n_views=2, batch=B,
                             n_chunks=n_chunks, chunk=chunk, inv_hw=1.0 / hw)

    flops = 2 * (M * K_pad * F_pad + R * M * F_pad
                 + R * F_pad * L_pad + R * L_pad * Q_pad + R * Q_pad * L_pad)
    bytes_accessed = int(
        patches.size * 2 + pool.size * 2
        + wc.size * 2 + wp.size * 2 + w1.size * 2 + w2.size * 2
        + (bc.size + bp.size + b1.size + gm.size + bt.size + b2.size) * 4
        + 2 * R * L_pad * 4)

    p, z = pl.pallas_call(
        kern,
        out_shape=(jax.ShapeDtypeStruct((R, L_pad), jnp.float32),   # predictor
                   jax.ShapeDtypeStruct((R, L_pad), jnp.float32)),  # projector
        scratch_shapes=[pltpu.VMEM((M, F_pad), jnp.bfloat16)],
        compiler_params=pltpu.CompilerParams(
            vmem_limit_bytes=32 * 1024 * 1024),
        cost_estimate=pl.CostEstimate(flops=flops,
                                      transcendentals=2 * Q_pad,
                                      bytes_accessed=bytes_accessed),
    )(patches, wc, bc, pool, wp, bp, w1, b1, gm, bt, w2, b2)

    p1 = p[:B, :latent_dim]
    p2 = p[B:N, :latent_dim]
    z1 = z[:B, :latent_dim]
    z2 = z[B:N, :latent_dim]
    return p1, p2, z1, z2


def init_params(key, in_ch, feature_dim, latent_dim):
    # TODO(synk): Encoder/Projector definitions were not provided in the
    # reference source; parameters below correspond to the documented stand-ins.
    ks = jax.random.split(key, 8)
    l4 = latent_dim // 4
    scale = 0.05
    return {
        "conv_w": scale * jax.random.normal(ks[0], (feature_dim, in_ch, 3, 3), jnp.float32),
        "conv_b": scale * jax.random.normal(ks[1], (feature_dim,), jnp.float32),
        "wp": scale * jax.random.normal(ks[2], (feature_dim, latent_dim), jnp.float32),
        "bp": scale * jax.random.normal(ks[3], (1, latent_dim), jnp.float32),
        "w1": scale * jax.random.normal(ks[4], (latent_dim, l4), jnp.float32),
        "b1": scale * jax.random.normal(ks[5], (1, l4), jnp.float32),
        "gamma": jnp.ones((1, l4), jnp.float32),
        "beta": jnp.zeros((1, l4), jnp.float32),
        "w2": scale * jax.random.normal(ks[6], (l4, latent_dim), jnp.float32),
        "b2": scale * jax.random.normal(ks[7], (1, latent_dim), jnp.float32),
    }


if __name__ == "__main__":
    B, C, H, W = 2, 4, 16, 16
    feature_dim, latent_dim = 32, 32

    key = jax.random.PRNGKey(0)
    k_x1, k_x2, k_p = jax.random.split(key, 3)
    x1 = jax.random.normal(k_x1, (B, C, H, W), jnp.float32)
    x2 = jax.random.normal(k_x2, (B, C, H, W), jnp.float32)
    params = init_params(k_p, C, feature_dim, latent_dim)

    fwd = jax.jit(simsiam_forward)
    p1, p2, z1, z2 = fwd(x1, x2, params)
    jax.block_until_ready((p1, p2, z1, z2))

    assert p1.shape == (B, latent_dim) and p2.shape == (B, latent_dim)
    assert z1.shape == (B, latent_dim) and z2.shape == (B, latent_dim)
    assert bool(jnp.all(jnp.isfinite(p1))) and bool(jnp.all(jnp.isfinite(p2)))
    assert bool(jnp.all(jnp.isfinite(z1))) and bool(jnp.all(jnp.isfinite(z2)))
    print("KERNEL_OK")
</pallas_src>

<mosaic_0001>
module attributes {stable_mosaic.version = 11 : i64} {
  func.func @_simsiam_kernel(%arg0: memref<1024x128xbf16, #tpu.memory_space<vmem>>, %arg1: memref<128x128xbf16, #tpu.memory_space<vmem>>, %arg2: memref<1x128xf32, #tpu.memory_space<vmem>>, %arg3: memref<8x1024xbf16, #tpu.memory_space<vmem>>, %arg4: memref<128x128xbf16, #tpu.memory_space<vmem>>, %arg5: memref<1x128xf32, #tpu.memory_space<vmem>>, %arg6: memref<128x128xbf16, #tpu.memory_space<vmem>>, %arg7: memref<1x128xf32, #tpu.memory_space<vmem>>, %arg8: memref<1x128xf32, #tpu.memory_space<vmem>>, %arg9: memref<1x128xf32, #tpu.memory_space<vmem>>, %arg10: memref<128x128xbf16, #tpu.memory_space<vmem>>, %arg11: memref<1x128xf32, #tpu.memory_space<vmem>>, %arg12: memref<8x128xf32, #tpu.memory_space<vmem>>, %arg13: memref<8x128xf32, #tpu.memory_space<vmem>>, %arg14: memref<1024x128xbf16, #tpu.memory_space<vmem>>) attributes {dimension_semantics = [], scalar_prefetch = 0 : i64, scratch_operands = 1 : i64, tpu.core_type = #tpu.core_type<tc>} {
    %c0 = arith.constant 0 : index
    %c0_0 = arith.constant 0 : index
    %0 = vector.load %arg0[%c0, %c0_0] : memref<1024x128xbf16, #tpu.memory_space<vmem>>, vector<256x128xbf16>
    %c0_1 = arith.constant 0 : index
    %c0_2 = arith.constant 0 : index
    %1 = vector.load %arg1[%c0_1, %c0_2] : memref<128x128xbf16, #tpu.memory_space<vmem>>, vector<128x128xbf16>
    %cst = arith.constant dense<0.000000e+00> : vector<256x128xf32>
    %2 = tpu.matmul %0, %1, %cst {dimension_numbers = #tpu.dot_dimension_numbers<[1], [0], [0], [1], [0, 0, 1, 1], [], []>} : vector<256x128xbf16>, vector<128x128xbf16>, vector<256x128xf32> -> vector<256x128xf32>
    %c0_3 = arith.constant 0 : index
    %c0_4 = arith.constant 0 : index
    %3 = vector.load %arg2[%c0_3, %c0_4] : memref<1x128xf32, #tpu.memory_space<vmem>>, vector<1x128xf32>
    %4 = vector.broadcast %3 : vector<1x128xf32> to vector<256x128xf32>
    %5 = arith.addf %2, %4 : vector<256x128xf32>
    %cst_5 = arith.constant 0.000000e+00 : f32
    %6 = vector.broadcast %cst_5 : f32 to vector<256x128xf32>
    %7 = arith.maximumf %5, %6 : vector<256x128xf32>
    %8 = arith.truncf %7 : vector<256x128xf32> to vector<256x128xbf16>
    %c0_6 = arith.constant 0 : index
    %c0_7 = arith.constant 0 : index
    %9 = vector.load %arg14[%c0_6, %c0_7] : memref<1024x128xbf16, #tpu.memory_space<vmem>>, vector<256x128xbf16>
    tpu.vector_store %arg14[%c0_6, %c0_7], %8 {strides = array<i32>} : memref<1024x128xbf16, #tpu.memory_space<vmem>>, vector<256x128xbf16>,
    %c256 = arith.constant 256 : index
    %c0_8 = arith.constant 0 : index
    %10 = vector.load %arg0[%c256, %c0_8] : memref<1024x128xbf16, #tpu.memory_space<vmem>>, vector<256x128xbf16>
    %c0_9 = arith.constant 0 : index
    %c0_10 = arith.constant 0 : index
    %11 = vector.load %arg1[%c0_9, %c0_10] : memref<128x128xbf16, #tpu.memory_space<vmem>>, vector<128x128xbf16>
    %cst_11 = arith.constant dense<0.000000e+00> : vector<256x128xf32>
    %12 = tpu.matmul %10, %11, %cst_11 {dimension_numbers = #tpu.dot_dimension_numbers<[1], [0], [0], [1], [0, 0, 1, 1], [], []>} : vector<256x128xbf16>, vector<128x128xbf16>, vector<256x128xf32> -> vector<256x128xf32>
    %c0_12 = arith.constant 0 : index
    %c0_13 = arith.constant 0 : index
    %13 = vector.load %arg2[%c0_12, %c0_13] : memref<1x128xf32, #tpu.memory_space<vmem>>, vector<1x128xf32>
    %14 = vector.broadcast %13 : vector<1x128xf32> to vector<256x128xf32>
    %15 = arith.addf %12, %14 : vector<256x128xf32>
    %cst_14 = arith.constant 0.000000e+00 : f32
    %16 = vector.broadcast %cst_14 : f32 to vector<256x128xf32>
    %17 = arith.maximumf %15, %16 : vector<256x128xf32>
    %18 = arith.truncf %17 : vector<256x128xf32> to vector<256x128xbf16>
    %c256_15 = arith.constant 256 : index
    %c0_16 = arith.constant 0 : index
    %19 = vector.load %arg14[%c256_15, %c0_16] : memref<1024x128xbf16, #tpu.memory_space<vmem>>, vector<256x128xbf16>
    tpu.vector_store %arg14[%c256_15, %c0_16], %18 {strides = array<i32>} : memref<1024x128xbf16, #tpu.memory_space<vmem>>, vector<256x128xbf16>,
    %c512 = arith.constant 512 : index
    %c0_17 = arith.constant 0 : index
    %20 = vector.load %arg0[%c512, %c0_17] : memref<1024x128xbf16, #tpu.memory_space<vmem>>, vector<256x128xbf16>
    %c0_18 = arith.constant 0 : index
    %c0_19 = arith.constant 0 : index
    %21 = vector.load %arg1[%c0_18, %c0_19] : memref<128x128xbf16, #tpu.memory_space<vmem>>, vector<128x128xbf16>
    %cst_20 = arith.constant dense<0.000000e+00> : vector<256x128xf32>
    %22 = tpu.matmul %20, %21, %cst_20 {dimension_numbers = #tpu.dot_dimension_numbers<[1], [0], [0], [1], [0, 0, 1, 1], [], []>} : vector<256x128xbf16>, vector<128x128xbf16>, vector<256x128xf32> -> vector<256x128xf32>
    %c0_21 = arith.constant 0 : index
    %c0_22 = arith.constant 0 : index
    %23 = vector.load %arg2[%c0_21, %c0_22] : memref<1x128xf32, #tpu.memory_space<vmem>>, vector<1x128xf32>
    %24 = vector.broadcast %23 : vector<1x128xf32> to vector<256x128xf32>
    %25 = arith.addf %22, %24 : vector<256x128xf32>
    %cst_23 = arith.constant 0.000000e+00 : f32
    %26 = vector.broadcast %cst_23 : f32 to vector<256x128xf32>
    %27 = arith.maximumf %25, %26 : vector<256x128xf32>
    %28 = arith.truncf %27 : vector<256x128xf32> to vector<256x128xbf16>
    %c512_24 = arith.constant 512 : index
    %c0_25 = arith.constant 0 : index
    %29 = vector.load %arg14[%c512_24, %c0_25] : memref<1024x128xbf16, #tpu.memory_space<vmem>>, vector<256x128xbf16>
    tpu.vector_store %arg14[%c512_24, %c0_25], %28 {strides = array<i32>} : memref<1024x128xbf16, #tpu.memory_space<vmem>>, vector<256x128xbf16>,
    %c768 = arith.constant 768 : index
    %c0_26 = arith.constant 0 : index
    %30 = vector.load %arg0[%c768, %c0_26] : memref<1024x128xbf16, #tpu.memory_space<vmem>>, vector<256x128xbf16>
    %c0_27 = arith.constant 0 : index
    %c0_28 = arith.constant 0 : index
    %31 = vector.load %arg1[%c0_27, %c0_28] : memref<128x128xbf16, #tpu.memory_space<vmem>>, vector<128x128xbf16>
    %cst_29 = arith.constant dense<0.000000e+00> : vector<256x128xf32>
    %32 = tpu.matmul %30, %31, %cst_29 {dimension_numbers = #tpu.dot_dimension_numbers<[1], [0], [0], [1], [0, 0, 1, 1], [], []>} : vector<256x128xbf16>, vector<128x128xbf16>, vector<256x128xf32> -> vector<256x128xf32>
    %c0_30 = arith.constant 0 : index
    %c0_31 = arith.constant 0 : index
    %33 = vector.load %arg2[%c0_30, %c0_31] : memref<1x128xf32, #tpu.memory_space<vmem>>, vector<1x128xf32>
    %34 = vector.broadcast %33 : vector<1x128xf32> to vector<256x128xf32>
    %35 = arith.addf %32, %34 : vector<256x128xf32>
    %cst_32 = arith.constant 0.000000e+00 : f32
    %36 = vector.broadcast %cst_32 : f32 to vector<256x128xf32>
    %37 = arith.maximumf %35, %36 : vector<256x128xf32>
    %38 = arith.truncf %37 : vector<256x128xf32> to vector<256x128xbf16>
    %c768_33 = arith.constant 768 : index
    %c0_34 = arith.constant 0 : index
    %39 = vector.load %arg14[%c768_33, %c0_34] : memref<1024x128xbf16, #tpu.memory_space<vmem>>, vector<256x128xbf16>
    tpu.vector_store %arg14[%c768_33, %c0_34], %38 {strides = array<i32>} : memref<1024x128xbf16, #tpu.memory_space<vmem>>, vector<256x128xbf16>,
    %c0_35 = arith.constant 0 : index
    %c0_36 = arith.constant 0 : index
    %40 = vector.load %arg3[%c0_35, %c0_36] : memref<8x1024xbf16, #tpu.memory_space<vmem>>, vector<8x1024xbf16>
    %c0_37 = arith.constant 0 : index
    %c0_38 = arith.constant 0 : index
    %41 = vector.load %arg14[%c0_37, %c0_38] : memref<1024x128xbf16, #tpu.memory_space<vmem>>, vector<1024x128xbf16>
    %cst_39 = arith.constant dense<0.000000e+00> : vector<8x128xf32>
    %42 = tpu.matmul %40, %41, %cst_39 {dimension_numbers = #tpu.dot_dimension_numbers<[1], [0], [0], [1], [0, 0, 1, 1], [], []>} : vector<8x1024xbf16>, vector<1024x128xbf16>, vector<8x128xf32> -> vector<8x128xf32>
    %cst_40 = arith.constant 3.906250e-03 : f32
    %43 = vector.broadcast %cst_40 : f32 to vector<8x128xf32>
    %44 = arith.mulf %42, %43 : vector<8x128xf32>
    %45 = arith.truncf %44 : vector<8x128xf32> to vector<8x128xbf16>
    %c0_41 = arith.constant 0 : index
    %c0_42 = arith.constant 0 : index
    %46 = vector.load %arg4[%c0_41, %c0_42] : memref<128x128xbf16, #tpu.memory_space<vmem>>, vector<128x128xbf16>
    %cst_43 = arith.constant dense<0.000000e+00> : vector<8x128xf32>
    %47 = tpu.matmul %45, %46, %cst_43 {dimension_numbers = #tpu.dot_dimension_numbers<[1], [0], [0], [1], [0, 0, 1, 1], [], []>} : vector<8x128xbf16>, vector<128x128xbf16>, vector<8x128xf32> -> vector<8x128xf32>
    %c0_44 = arith.constant 0 : index
    %c0_45 = arith.constant 0 : index
    %48 = vector.load %arg5[%c0_44, %c0_45] : memref<1x128xf32, #tpu.memory_space<vmem>>, vector<1x128xf32>
    %49 = vector.broadcast %48 : vector<1x128xf32> to vector<8x128xf32>
    %50 = arith.addf %47, %49 : vector<8x128xf32>
    %c0_46 = arith.constant 0 : index
    %c0_47 = arith.constant 0 : index
    %51 = vector.load %arg13[%c0_46, %c0_47] : memref<8x128xf32, #tpu.memory_space<vmem>>, vector<8x128xf32>
    tpu.vector_store %arg13[%c0_46, %c0_47], %50 {strides = array<i32>} : memref<8x128xf32, #tpu.memory_space<vmem>>, vector<8x128xf32>,
    %52 = arith.truncf %50 : vector<8x128xf32> to vector<8x128xbf16>
    %c0_48 = arith.constant 0 : index
    %c0_49 = arith.constant 0 : index
    %53 = vector.load %arg6[%c0_48, %c0_49] : memref<128x128xbf16, #tpu.memory_space<vmem>>, vector<128x128xbf16>
    %cst_50 = arith.constant dense<0.000000e+00> : vector<8x128xf32>
    %54 = tpu.matmul %52, %53, %cst_50 {dimension_numbers = #tpu.dot_dimension_numbers<[1], [0], [0], [1], [0, 0, 1, 1], [], []>} : vector<8x128xbf16>, vector<128x128xbf16>, vector<8x128xf32> -> vector<8x128xf32>
    %c0_51 = arith.constant 0 : index
    %c0_52 = arith.constant 0 : index
    %55 = vector.load %arg7[%c0_51, %c0_52] : memref<1x128xf32, #tpu.memory_space<vmem>>, vector<1x128xf32>
    %56 = vector.broadcast %55 : vector<1x128xf32> to vector<8x128xf32>
    %57 = arith.addf %54, %56 : vector<8x128xf32>
    %58 = tpu.iota {dimensions = array<i32: 0>} : vector<8x1xi32>
    %cst_53 = arith.constant 0.000000e+00 : f32
    %59 = vector.broadcast %cst_53 : f32 to vector<8x128xf32>
    %c0_i32 = arith.constant 0 : i32
    %60 = vector.broadcast %c0_i32 : i32 to vector<8x1xi32>
    %61 = arith.cmpi sge, %58, %60 : vector<8x1xi32>
    %c2_i32 = arith.constant 2 : i32
    %62 = vector.broadcast %c2_i32 : i32 to vector<8x1xi32>
    %63 = arith.cmpi slt, %58, %62 : vector<8x1xi32>
    %64 = arith.andi %61, %63 : vector<8x1xi1>
    %65 = arith.extui %64 : vector<8x1xi1> to vector<8x1xi32>
    %66 = arith.sitofp %65 : vector<8x1xi32> to vector<8x1xf32>
    %67 = vector.broadcast %66 : vector<8x1xf32> to vector<8x128xf32>
    %68 = arith.mulf %57, %67 : vector<8x128xf32>
    %cst_54 = arith.constant dense<0.000000e+00> : vector<128xf32>
    %69 = vector.multi_reduction <add>, %68, %cst_54 [0] : vector<8x128xf32> to vector<128xf32>
    %70 = vector.shape_cast %69 : vector<128xf32> to vector<1x128xf32>
    %cst_55 = arith.constant 5.000000e-01 : f32
    %71 = vector.broadcast %cst_55 : f32 to vector<1x128xf32>
    %72 = arith.mulf %70, %71 : vector<1x128xf32>
    %73 = vector.broadcast %72 : vector<1x128xf32> to vector<8x128xf32>
    %74 = arith.subf %57, %73 : vector<8x128xf32>
    %75 = arith.mulf %74, %74 : vector<8x128xf32>
    %76 = vector.broadcast %66 : vector<8x1xf32> to vector<8x128xf32>
    %77 = arith.mulf %75, %76 : vector<8x128xf32>
    %cst_56 = arith.constant dense<0.000000e+00> : vector<128xf32>
    %78 = vector.multi_reduction <add>, %77, %cst_56 [0] : vector<8x128xf32> to vector<128xf32>
    %79 = vector.shape_cast %78 : vector<128xf32> to vector<1x128xf32>
    %cst_57 = arith.constant 5.000000e-01 : f32
    %80 = vector.broadcast %cst_57 : f32 to vector<1x128xf32>
    %81 = arith.mulf %79, %80 : vector<1x128xf32>
    %82 = vector.broadcast %72 : vector<1x128xf32> to vector<8x128xf32>
    %83 = arith.subf %57, %82 : vector<8x128xf32>
    %cst_58 = arith.constant 9.99999974E-6 : f32
    %84 = vector.broadcast %cst_58 : f32 to vector<1x128xf32>
    %85 = arith.addf %81, %84 : vector<1x128xf32>
    %86 = math.rsqrt %85 : vector<1x128xf32>
    %87 = vector.broadcast %86 : vector<1x128xf32> to vector<8x128xf32>
    %88 = arith.mulf %83, %87 : vector<8x128xf32>
    %89 = vector.broadcast %66 : vector<8x1xf32> to vector<8x128xf32>
    %90 = arith.mulf %89, %88 : vector<8x128xf32>
    %91 = arith.addf %59, %90 : vector<8x128xf32>
    %c2_i32_59 = arith.constant 2 : i32
    %92 = vector.broadcast %c2_i32_59 : i32 to vector<8x1xi32>
    %93 = arith.cmpi sge, %58, %92 : vector<8x1xi32>
    %c4_i32 = arith.constant 4 : i32
    %94 = vector.broadcast %c4_i32 : i32 to vector<8x1xi32>
    %95 = arith.cmpi slt, %58, %94 : vector<8x1xi32>
    %96 = arith.andi %93, %95 : vector<8x1xi1>
    %97 = arith.extui %96 : vector<8x1xi1> to vector<8x1xi32>
    %98 = arith.sitofp %97 : vector<8x1xi32> to vector<8x1xf32>
    %99 = vector.broadcast %98 : vector<8x1xf32> to vector<8x128xf32>
    %100 = arith.mulf %57, %99 : vector<8x128xf32>
    %cst_60 = arith.constant dense<0.000000e+00> : vector<128xf32>
    %101 = vector.multi_reduction <add>, %100, %cst_60 [0] : vector<8x128xf32> to vector<128xf32>
    %102 = vector.shape_cast %101 : vector<128xf32> to vector<1x128xf32>
    %cst_61 = arith.constant 5.000000e-01 : f32
    %103 = vector.broadcast %cst_61 : f32 to vector<1x128xf32>
    %104 = arith.mulf %102, %103 : vector<1x128xf32>
    %105 = vector.broadcast %104 : vector<1x128xf32> to vector<8x128xf32>
    %106 = arith.subf %57, %105 : vector<8x128xf32>
    %107 = arith.mulf %106, %106 : vector<8x128xf32>
    %108 = vector.broadcast %98 : vector<8x1xf32> to vector<8x128xf32>
    %109 = arith.mulf %107, %108 : vector<8x128xf32>
    %cst_62 = arith.constant dense<0.000000e+00> : vector<128xf32>
    %110 = vector.multi_reduction <add>, %109, %cst_62 [0] : vector<8x128xf32> to vector<128xf32>
    %111 = vector.shape_cast %110 : vector<128xf32> to vector<1x128xf32>
    %cst_63 = arith.constant 5.000000e-01 : f32
    %112 = vector.broadcast %cst_63 : f32 to vector<1x128xf32>
    %113 = arith.mulf %111, %112 : vector<1x128xf32>
    %114 = vector.broadcast %104 : vector<1x128xf32> to vector<8x128xf32>
    %115 = arith.subf %57, %114 : vector<8x128xf32>
    %cst_64 = arith.constant 9.99999974E-6 : f32
    %116 = vector.broadcast %cst_64 : f32 to vector<1x128xf32>
    %117 = arith.addf %113, %116 : vector<1x128xf32>
    %118 = math.rsqrt %117 : vector<1x128xf32>
    %119 = vector.broadcast %118 : vector<1x128xf32> to vector<8x128xf32>
    %120 = arith.mulf %115, %119 : vector<8x128xf32>
    %121 = vector.broadcast %98 : vector<8x1xf32> to vector<8x128xf32>
    %122 = arith.mulf %121, %120 : vector<8x128xf32>
    %123 = arith.addf %91, %122 : vector<8x128xf32>
    %c0_65 = arith.constant 0 : index
    %c0_66 = arith.constant 0 : index
    %124 = vector.load %arg8[%c0_65, %c0_66] : memref<1x128xf32, #tpu.memory_space<vmem>>, vector<1x128xf32>
    %125 = vector.broadcast %124 : vector<1x128xf32> to vector<8x128xf32>
    %126 = arith.mulf %123, %125 : vector<8x128xf32>
    %c0_67 = arith.constant 0 : index
    %c0_68 = arith.constant 0 : index
    %127 = vector.load %arg9[%c0_67, %c0_68] : memref<1x128xf32, #tpu.memory_space<vmem>>, vector<1x128xf32>
    %128 = vector.broadcast %127 : vector<1x128xf32> to vector<8x128xf32>
    %129 = arith.addf %126, %128 : vector<8x128xf32>
    %cst_69 = arith.constant 0.000000e+00 : f32
    %130 = vector.broadcast %cst_69 : f32 to vector<8x128xf32>
    %131 = arith.maximumf %129, %130 : vector<8x128xf32>
    %132 = arith.truncf %131 : vector<8x128xf32> to vector<8x128xbf16>
    %c0_70 = arith.constant 0 : index
    %c0_71 = arith.constant 0 : index
    %133 = vector.load %arg10[%c0_70, %c0_71] : memref<128x128xbf16, #tpu.memory_space<vmem>>, vector<128x128xbf16>
    %cst_72 = arith.constant dense<0.000000e+00> : vector<8x128xf32>
    %134 = tpu.matmul %132, %133, %cst_72 {dimension_numbers = #tpu.dot_dimension_numbers<[1], [0], [0], [1], [0, 0, 1, 1], [], []>} : vector<8x128xbf16>, vector<128x128xbf16>, vector<8x128xf32> -> vector<8x128xf32>
    %c0_73 = arith.constant 0 : index
    %c0_74 = arith.constant 0 : index
    %135 = vector.load %arg11[%c0_73, %c0_74] : memref<1x128xf32, #tpu.memory_space<vmem>>, vector<1x128xf32>
    %136 = vector.broadcast %135 : vector<1x128xf32> to vector<8x128xf32>
    %137 = arith.addf %134, %136 : vector<8x128xf32>
    %c0_75 = arith.constant 0 : index
    %c0_76 = arith.constant 0 : index
    %138 = vector.load %arg12[%c0_75, %c0_76] : memref<8x128xf32, #tpu.memory_space<vmem>>, vector<8x128xf32>
    tpu.vector_store %arg12[%c0_75, %c0_76], %137 {strides = array<i32>} : memref<8x128xf32, #tpu.memory_space<vmem>>, vector<8x128xf32>,
    return
  }
}

</mosaic_0001>

<bundles_post_ra>
// kernel: simsiam_forward.1
= control target key start
LH: loop header
LB: loop body
LE: loop exit
PB: predicated region body
PF: predicated region fallthrough
CT: control target
= control target key end

     0   :  { %vm4885_vm0 = vmmov 0   ;;  %s5537_s1 = inlined_call_operand.vmem [shape: bf16[128,128], index: 1, kind: input, shape index: {}]   ;;  %s5538_s0 = inlined_call_operand.vmem [shape: bf16[1024,128], index: 0, kind: input, shape index: {}]   ;;  %s5539_s2 = inlined_call_operand.vmem [shape: f32[1,128], index: 2, kind: input, shape index: {}]   ;;  %s5540_s3 = inlined_call_operand.vmem [shape: bf16[8,1024], index: 3, kind: input, shape index: {}]   ;;  %s5541_s4 = inlined_call_operand.vmem [shape: bf16[128,128], index: 4, kind: input, shape index: {}]   ;;  %s5542_s6 = inlined_call_operand.vmem [shape: bf16[128,128], index: 6, kind: input, shape index: {}]   ;;  %s5543_s5 = inlined_call_operand.vmem [shape: f32[1,128], index: 5, kind: input, shape index: {}]   ;;  %s5544_s13 = inlined_call_operand.vmem [shape: f32[8,128], index: 13, kind: output, shape index: {1}]   ;;  %s5545_s10 = inlined_call_operand.vmem [shape: bf16[128,128], index: 10, kind: input, shape index: {}]   ;;  %s5546_s7 = inlined_call_operand.vmem [shape: f32[1,128], index: 7, kind: input, shape index: {}]   ;;  %s5547_s8 = inlined_call_operand.vmem [shape: f32[1,128], index: 8, kind: input, shape index: {}]   ;;  %s5548_s9 = inlined_call_operand.vmem [shape: f32[1,128], index: 9, kind: input, shape index: {}]   ;;  %s5549_s11 = inlined_call_operand.vmem [shape: f32[1,128], index: 11, kind: input, shape index: {}]   ;;  %s5550_s12 = inlined_call_operand.vmem [shape: f32[8,128], index: 12, kind: output, shape index: {0}]  }
   0x1   :  { %v4685_v0 = vld [vmem:[%s5537_s1 + $0x38] sm:$0xff]   ;;  %v4687_v2 = vld [vmem:[%s5537_s1 + $0x30] sm:$0xff]   ;;  %v4689_v4 = vld [vmem:[%s5537_s1 + $0x28] sm:$0xff]  }
   0x2   :  { %v4686_v1 = vld [vmem:[%s5537_s1 + $0x38] sm:$0xff]   ;;  %4431 = vmatprep.subr.bf16.mxu0 %v4685_v0  ;;  %v4688_v3 = vld [vmem:[%s5537_s1 + $0x30] sm:$0xff]   ;;  %v4690_v5 = vld [vmem:[%s5537_s1 + $0x28] sm:$0xff]  }
   0x3   :  { %4479 = vmatprep.subr.bf16.mxu1 %v4686_v1  ;;  %4432 = vmatpush3.bf16.msra.mxu0 %v4685_v0  ;;  %v4691_v6 = vld [vmem:[%s5537_s1 + $0x20] sm:$0xff]   ;;  %v4693_v8 = vld [vmem:[%s5537_s1 + $0x18] sm:$0xff]   ;;  %v4695_v10 = vld [vmem:[%s5537_s1 + $0x10] sm:$0xff]  }
   0x4   :  { %4480 = vmatpush3.bf16.msra.mxu1 %v4686_v1  ;;  %4433 = vmatprep.subr.bf16.mxu0 %v4687_v2  ;;  %v4692_v7 = vld [vmem:[%s5537_s1 + $0x20] sm:$0xff]   ;;  %v4694_v9 = vld [vmem:[%s5537_s1 + $0x18] sm:$0xff]   ;;  %v4696_v11 = vld [vmem:[%s5537_s1 + $0x10] sm:$0xff]  }
   0x5   :  { %4481 = vmatprep.subr.bf16.mxu1 %v4688_v3  ;;  %v4701_v12 = vld [vmem:[%s5538_s0] sm:$0xff]   ;;  %v4697_v14 = vld [vmem:[%s5537_s1 + $0x8] sm:$0xff]   ;;  %v4705_v19 = vld [vmem:[%s5537_s1 + $0x38] sm:$0xff]  }
   0x6   :  { %v4702_v13 = vld [vmem:[%s5538_s0 + $0x80] sm:$0xff]   ;;  %4447 = vmatprep.mubr.bf16.mxu0 %v4701_v12  ;;  %v4698_v15 = vld [vmem:[%s5537_s1 + $0x8] sm:$0xff]   ;;  %v4706_v20 = vld [vmem:[%s5537_s1 + $0x38] sm:$0xff]  }
   0x7   :  { %4434 = vmatpush3.bf16.msra.mxu0 %v4687_v2  ;;  %4495 = vmatprep.mubr.bf16.mxu1 %v4702_v13  ;;  %v4699_v16 = vld [vmem:[%s5537_s1] sm:$0xff]   ;;  %v4703_v18 = vld [vmem:[%s5538_s0 + $0x8] sm:$0xff]   ;;  %v4707_v22 = vld [vmem:[%s5538_s0 + $0x10] sm:$0xff]  }
   0x8   :  { %4482 = vmatpush3.bf16.msra.mxu1 %v4688_v3  ;;  %4435 = vmatprep.subr.bf16.mxu0 %v4689_v4  ;;  %v4700_v17 = vld [vmem:[%s5537_s1] sm:$0xff]   ;;  %v4704_v21 = vld [vmem:[%s5538_s0 + $0x88] sm:$0xff]   ;;  %v4708_v23 = vld [vmem:[%s5538_s0 + $0x90] sm:$0xff]  }
   0x9   :  { %4483 = vmatprep.subr.bf16.mxu1 %v4690_v5  ;;  %v4711_v24 = vld [vmem:[%s5537_s1 + $0x30] sm:$0xff]   ;;  %v4709_v26 = vld [vmem:[%s5538_s0 + $0x18] sm:$0xff]   ;;  %v4717_v27 = vld [vmem:[%s5537_s1 + $0x28] sm:$0xff]  }
   0xa   :  { %v4712_v25 = vld [vmem:[%s5537_s1 + $0x30] sm:$0xff]   ;;  %v4718_v28 = vld [vmem:[%s5537_s1 + $0x28] sm:$0xff]   ;;  %v4710_v29 = vld [vmem:[%s5538_s0 + $0x98] sm:$0xff]  }
   0xb   :  { %4436 = vmatpush3.bf16.msra.mxu0 %v4689_v4  ;;  %v4713_v30 = vld [vmem:[%s5538_s0 + $0x20] sm:$0xff]   ;;  %v4715_v34 = vld [vmem:[%s5538_s0 + $0x28] sm:$0xff]   ;;  %v4729_v36 = vld [vmem:[%s5537_s1 + $0x18] sm:$0xff]  }
   0xc   :  { %4484 = vmatpush3.bf16.msra.mxu1 %v4690_v5  ;;  %4437 = vmatprep.subr.bf16.mxu0 %v4691_v6  ;;  %v4714_v31 = vld [vmem:[%s5538_s0 + $0xa0] sm:$0xff]   ;;  %v4716_v35 = vld [vmem:[%s5538_s0 + $0xa8] sm:$0xff]   ;;  %v4730_v37 = vld [vmem:[%s5537_s1 + $0x18] sm:$0xff]  }
   0xd   :  { %4485 = vmatprep.subr.bf16.mxu1 %v4692_v7  ;;  %v4723_v32 = vld [vmem:[%s5537_s1 + $0x20] sm:$0xff]   ;;  %v4719_v38 = vld [vmem:[%s5538_s0 + $0x30] sm:$0xff]   ;;  %v4721_v42 = vld [vmem:[%s5538_s0 + $0x38] sm:$0xff]  }
   0xe   :  { %v4724_v33 = vld [vmem:[%s5537_s1 + $0x20] sm:$0xff]   ;;  %v4720_v39 = vld [vmem:[%s5538_s0 + $0xb0] sm:$0xff]   ;;  %v4722_v43 = vld [vmem:[%s5538_s0 + $0xb8] sm:$0xff]  }
   0xf   :  { %4438 = vmatpush3.bf16.msra.mxu0 %v4691_v6  ;;  %v4735_v40 = vld [vmem:[%s5537_s1 + $0x10] sm:$0xff]   ;;  %v4725_v44 = vld [vmem:[%s5538_s0 + $0x40] sm:$0xff]   ;;  %v4741_v46 = vld [vmem:[%s5537_s1 + $0x8] sm:$0xff]  }
  0x10   :  { %4486 = vmatpush3.bf16.msra.mxu1 %v4692_v7  ;;  %4439 = vmatprep.subr.bf16.mxu0 %v4693_v8  ;;  %v4736_v41 = vld [vmem:[%s5537_s1 + $0x10] sm:$0xff]   ;;  %v4726_v45 = vld [vmem:[%s5538_s0 + $0xc0] sm:$0xff]   ;;  %v4742_v47 = vld [vmem:[%s5537_s1 + $0x8] sm:$0xff]  }
  0x11   :  { %4487 = vmatprep.subr.bf16.mxu1 %v4694_v9  ;;  %v4727_v48 = vld [vmem:[%s5538_s0 + $0x48] sm:$0xff]   ;;  %v4731_v50 = vld [vmem:[%s5538_s0 + $0x50] sm:$0xff]   ;;  %v4747_v51 = vld [vmem:[%s5537_s1] sm:$0xff]  }
  0x12   :  { %v4728_v49 = vld [vmem:[%s5538_s0 + $0xc8] sm:$0xff]   ;;  %v4748_v52 = vld [vmem:[%s5537_s1] sm:$0xff]   ;;  %v4732_v53 = vld [vmem:[%s5538_s0 + $0xd0] sm:$0xff]  }
  0x13   :  { %4440 = vmatpush3.bf16.msra.mxu0 %v4693_v8  ;;  %v4733_v54 = vld [vmem:[%s5538_s0 + $0x58] sm:$0xff]   ;;  %v4737_v56 = vld [vmem:[%s5538_s0 + $0x60] sm:$0xff]   ;;  %v4739_v58 = vld [vmem:[%s5538_s0 + $0x68] sm:$0xff]  }
  0x14   :  { %4488 = vmatpush3.bf16.msra.mxu1 %v4694_v9  ;;  %4441 = vmatprep.subr.bf16.mxu0 %v4695_v10  ;;  %v4734_v55 = vld [vmem:[%s5538_s0 + $0xd8] sm:$0xff]   ;;  %v4738_v57 = vld [vmem:[%s5538_s0 + $0xe0] sm:$0xff]   ;;  %v4740_v59 = vld [vmem:[%s5538_s0 + $0xe8] sm:$0xff]  }
  0x15   :  { %4489 = vmatprep.subr.bf16.mxu1 %v4696_v11  ;;  %v4743_v60 = vld [vmem:[%s5538_s0 + $0x70] sm:$0xff]   ;;  %v4745_v62 = vld [vmem:[%s5538_s0 + $0x78] sm:$0xff]   ;;  %v4749_v0 = vld [vmem:[%s5538_s0 + $0x100] sm:$0xff]  }
  0x16   :  { %v4744_v61 = vld [vmem:[%s5538_s0 + $0xf0] sm:$0xff]   ;;  %v4746_v63 = vld [vmem:[%s5538_s0 + $0xf8] sm:$0xff]   ;;  %v4750_v1 = vld [vmem:[%s5538_s0 + $0x180] sm:$0xff]  }
  0x17   :  { %4442 = vmatpush3.bf16.msra.mxu0 %v4695_v10  ;;  %v4751_v2 = vld [vmem:[%s5538_s0 + $0x108] sm:$0xff]   ;;  %v4753_v4 = vld [vmem:[%s5538_s0 + $0x110] sm:$0xff]   ;;  %v4755_v6 = vld [vmem:[%s5538_s0 + $0x118] sm:$0xff]  }
  0x18   :  { %4490 = vmatpush3.bf16.msra.mxu1 %v4696_v11  ;;  %4443 = vmatprep.subr.bf16.mxu0 %v4697_v14  ;;  %v4752_v3 = vld [vmem:[%s5538_s0 + $0x188] sm:$0xff]   ;;  %v4754_v5 = vld [vmem:[%s5538_s0 + $0x190] sm:$0xff]   ;;  %v4756_v7 = vld [vmem:[%s5538_s0 + $0x198] sm:$0xff]  }
  0x19   :  { %4491 = vmatprep.subr.bf16.mxu1 %v4698_v15  ;;  %v4757_v8 = vld [vmem:[%s5538_s0 + $0x120] sm:$0xff]   ;;  %v4759_v10 = vld [vmem:[%s5538_s0 + $0x128] sm:$0xff]   ;;  %v4761_v12 = vld [vmem:[%s5538_s0 + $0x130] sm:$0xff]  }
  0x1a   :  { %v4758_v9 = vld [vmem:[%s5538_s0 + $0x1a0] sm:$0xff]   ;;  %v4760_v11 = vld [vmem:[%s5538_s0 + $0x1a8] sm:$0xff]   ;;  %v4762_v13 = vld [vmem:[%s5538_s0 + $0x1b0] sm:$0xff]  }
  0x1b   :  { %4444 = vmatpush3.bf16.msra.mxu0 %v4697_v14  ;;  %v4763_v14 = vld [vmem:[%s5538_s0 + $0x138] sm:$0xff]  }
  0x1c   :  { %4492 = vmatpush3.bf16.msra.mxu1 %v4698_v15  ;;  %4445 = vmatprep.subr.bf16.mxu0 %v4699_v16  ;;  %v4764_v15 = vld [vmem:[%s5538_s0 + $0x1b8] sm:$0xff]  }
  0x1d   :  { %4493 = vmatprep.subr.bf16.mxu1 %v4700_v17 }
  0x1f   :  { %4446 = vmatpush3.bf16.msra.mxu0 %v4699_v16  ;;  %v4765_v16 = vld [vmem:[%s5538_s0 + $0x140] sm:$0xff]  }
  0x20   :  { %4494 = vmatpush3.bf16.msra.mxu1 %v4700_v17  ;;  %4527 = vmatprep.subr.bf16.mxu0 %v4705_v19  ;;  %v4766_v17 = vld [vmem:[%s5538_s0 + $0x1c0] sm:$0xff]  }
  0x21   :  { %4575 = vmatprep.subr.bf16.mxu1 %v4706_v20 }
  0x22   :  { %4448 = vmatmul.mubr.bf16.vlgmr.msra.gmra.mxu0 %v4703_v18  ;;  %v4767_v18 = vld [vmem:[%s5538_s0 + $0x148] sm:$0xff]  }
  0x23   :  { %4496 = vmatmul.mubr.bf16.vlgmr.msra.gmra.mxu1 %v4704_v21  ;;  %4528 = vmatpush3.bf16.msra.mxu0 %v4705_v19  ;;  %v4768_v19 = vld [vmem:[%s5538_s0 + $0x1c8] sm:$0xff]   ;;  %v4770_v21 = vld [vmem:[%s5538_s0 + $0x1d0] sm:$0xff]  }
  0x24   :  { %4576 = vmatpush3.bf16.msra.mxu1 %v4706_v20  ;;  %4451 = vmatprep.mubr.bf16.mxu0 %v4707_v22  ;;  %v4769_v20 = vld [vmem:[%s5538_s0 + $0x150] sm:$0xff]   ;;  %v4771_v22 = vld [vmem:[%s5538_s0 + $0x158] sm:$0xff]  }
  0x25   :  { %4499 = vmatprep.mubr.bf16.mxu1 %v4708_v23  ;;  %4529 = vmatprep.subr.bf16.mxu0 %v4711_v24  ;;  %v4772_v23 = vld [vmem:[%s5538_s0 + $0x1d8] sm:$0xff]  }
  0x26   :  { %4577 = vmatprep.subr.bf16.mxu1 %v4712_v25 }
  0x27   :  { %4530 = vmatpush3.bf16.msra.mxu0 %v4711_v24  ;;  %v4773_v24 = vld [vmem:[%s5538_s0 + $0x160] sm:$0xff]  }
  0x28   :  { %4578 = vmatpush3.bf16.msra.mxu1 %v4712_v25  ;;  %4531 = vmatprep.subr.bf16.mxu0 %v4717_v27  ;;  %v4774_v25 = vld [vmem:[%s5538_s0 + $0x1e0] sm:$0xff]  }
  0x29   :  { %4579 = vmatprep.subr.bf16.mxu1 %v4718_v28 }
  0x2a   :  { %4452 = vmatmul.mubr.bf16.gmra.mxu0 %v4709_v26  ;;  %v4775_v26 = vld [vmem:[%s5538_s0 + $0x168] sm:$0xff]  }
  0x2b   :  { %4500 = vmatmul.mubr.bf16.gmra.mxu1 %v4710_v29  ;;  %4455 = vmatprep.mubr.bf16.mxu0 %v4713_v30  ;;  %v4778_v29 = vld [vmem:[%s5538_s0 + $0x1f0] sm:$0xff]   ;;  %v4779_v30 = vld [vmem:[%s5538_s0 + $0x178] sm:$0xff]  }
  0x2c   :  { %4503 = vmatprep.mubr.bf16.mxu1 %v4714_v31  ;;  %4532 = vmatpush3.bf16.msra.mxu0 %v4717_v27  ;;  %v4776_v27 = vld [vmem:[%s5538_s0 + $0x1e8] sm:$0xff]   ;;  %v4780_v31 = vld [vmem:[%s5538_s0 + $0x1f8] sm:$0xff]  }
  0x2d   :  { %4580 = vmatpush3.bf16.msra.mxu1 %v4718_v28  ;;  %4533 = vmatprep.subr.bf16.mxu0 %v4723_v32  ;;  %v4777_v28 = vld [vmem:[%s5538_s0 + $0x170] sm:$0xff]  }
  0x2e   :  { %4581 = vmatprep.subr.bf16.mxu1 %v4724_v33 }
  0x30   :  { %4534 = vmatpush3.bf16.msra.mxu0 %v4723_v32 }
  0x31   :  { %4582 = vmatpush3.bf16.msra.mxu1 %v4724_v33  ;;  %4535 = vmatprep.subr.bf16.mxu0 %v4729_v36  ;;  %v5247_v33 = vld [vmem:[%s5539_s2] ss:$0 sm:$0xff] }
  0x32   :  { %4456 = vmatmul.mubr.bf16.gmra.mxu0 %v4715_v34  ;;  %4583 = vmatprep.subr.bf16.mxu1 %v4730_v37 }
  0x33   :  { %4504 = vmatmul.mubr.bf16.gmra.mxu1 %v4716_v35  ;;  %4459 = vmatprep.mubr.bf16.mxu0 %v4719_v38 }
  0x34   :  { %4507 = vmatprep.mubr.bf16.mxu1 %v4720_v39  ;;  %4536 = vmatpush3.bf16.msra.mxu0 %v4729_v36 }
  0x35   :  { %4584 = vmatpush3.bf16.msra.mxu1 %v4730_v37  ;;  %4537 = vmatprep.subr.bf16.mxu0 %v4735_v40 }
  0x36   :  { %4585 = vmatprep.subr.bf16.mxu1 %v4736_v41 }
  0x38   :  { %4538 = vmatpush3.bf16.msra.mxu0 %v4735_v40  ;;  %v2252_v40 = vld [vmem:[%s5540_s3] sm:$0xff] }
  0x39   :  { %4586 = vmatpush3.bf16.msra.mxu1 %v4736_v41  ;;  %4539 = vmatprep.subr.bf16.mxu0 %v4741_v46 }
  0x3a   :  { %4460 = vmatmul.mubr.bf16.gmra.mxu0 %v4721_v42  ;;  %4587 = vmatprep.subr.bf16.mxu1 %v4742_v47 }
  0x3b   :  { %4508 = vmatmul.mubr.bf16.gmra.mxu1 %v4722_v43  ;;  %4463 = vmatprep.mubr.bf16.mxu0 %v4725_v44  ;;  %v3607_v44 = vcombine.high %v2252_v40, %v2252_v40 }
  0x3c   :  { %4511 = vmatprep.mubr.bf16.mxu1 %v4726_v45  ;;  %4540 = vmatpush3.bf16.msra.mxu0 %v4741_v46 }
  0x3d   :  { %4588 = vmatpush3.bf16.msra.mxu1 %v4742_v47  ;;  %4541 = vmatprep.subr.bf16.mxu0 %v4747_v51 }
  0x3e   :  { %4589 = vmatprep.subr.bf16.mxu1 %v4748_v52 }
  0x40   :  { %4542 = vmatpush3.bf16.msra.mxu0 %v4747_v51 }
  0x41   :  { %4590 = vmatpush3.bf16.msra.mxu1 %v4748_v52 }
  0x42   :  { %4464 = vmatmul.mubr.bf16.gmra.mxu0 %v4727_v48  ;;  %v2253_v48 = vld [vmem:[%s5540_s3 + $0x8] sm:$0xff] }
  0x43   :  { %4512 = vmatmul.mubr.bf16.gmra.mxu1 %v4728_v49  ;;  %4467 = vmatprep.mubr.bf16.mxu0 %v4731_v50 }
  0x44   :  { %4515 = vmatprep.mubr.bf16.mxu1 %v4732_v53  ;;  %v3609_v53 = vcombine.high %v2253_v48, %v2253_v48 }
  0x4a   :  { %4468 = vmatmul.mubr.bf16.gmra.mxu0 %v4733_v54 }
  0x4b   :  { %4516 = vmatmul.mubr.bf16.gmra.mxu1 %v4734_v55  ;;  %4471 = vmatprep.mubr.bf16.mxu0 %v4737_v56 }
  0x4c   :  { %4519 = vmatprep.mubr.bf16.mxu1 %v4738_v57 }
  0x52   :  { %4472 = vmatmul.mubr.bf16.gmra.mxu0 %v4739_v58 }
  0x53   :  { %4520 = vmatmul.mubr.bf16.gmra.mxu1 %v4740_v59  ;;  %4475 = vmatprep.mubr.bf16.mxu0 %v4743_v60 }
  0x54   :  { %4523 = vmatprep.mubr.bf16.mxu1 %v4744_v61 }
  0x5a   :  { %4476 = vmatmul.mubr.bf16.gmra.mxu0 %v4745_v62 }
  0x5b   :  { %4524 = vmatmul.mubr.bf16.gmra.mxu1 %v4746_v63  ;;  %4543 = vmatprep.mubr.bf16.mxu0 %v4749_v0 }
  0x5c   :  { %4591 = vmatprep.mubr.bf16.mxu1 %v4750_v1 }
  0x62   :  { %4544 = vmatmul.mubr.bf16.vlgmr.msra.gmra.mxu0 %v4751_v2 }
  0x63   :  { %4592 = vmatmul.mubr.bf16.vlgmr.msra.gmra.mxu1 %v4752_v3  ;;  %4547 = vmatprep.mubr.bf16.mxu0 %v4753_v4 }
  0x64   :  { %4595 = vmatprep.mubr.bf16.mxu1 %v4754_v5 }
  0x6a   :  { %4548 = vmatmul.mubr.bf16.gmra.mxu0 %v4755_v6 }
  0x6b   :  { %4596 = vmatmul.mubr.bf16.gmra.mxu1 %v4756_v7  ;;  %4551 = vmatprep.mubr.bf16.mxu0 %v4757_v8 }
  0x6c   :  { %4599 = vmatprep.mubr.bf16.mxu1 %v4758_v9 }
  0x72   :  { %4552 = vmatmul.mubr.bf16.gmra.mxu0 %v4759_v10 }
  0x73   :  { %4600 = vmatmul.mubr.bf16.gmra.mxu1 %v4760_v11  ;;  %4555 = vmatprep.mubr.bf16.mxu0 %v4761_v12 }
  0x74   :  { %4603 = vmatprep.mubr.bf16.mxu1 %v4762_v13 }
  0x7a   :  { %4556 = vmatmul.mubr.bf16.gmra.mxu0 %v4763_v14 }
  0x7b   :  { %4604 = vmatmul.mubr.bf16.gmra.mxu1 %v4764_v15  ;;  %4559 = vmatprep.mubr.bf16.mxu0 %v4765_v16 }
  0x7c   :  { %4607 = vmatprep.mubr.bf16.mxu1 %v4766_v17 }
  0x82   :  { %4560 = vmatmul.mubr.bf16.gmra.mxu0 %v4767_v18 }
  0x83   :  { %4608 = vmatmul.mubr.bf16.gmra.mxu1 %v4768_v19  ;;  %4563 = vmatprep.mubr.bf16.mxu0 %v4769_v20 }
  0x84   :  { %4611 = vmatprep.mubr.bf16.mxu1 %v4770_v21 }
  0x8a   :  { %4564 = vmatmul.mubr.bf16.gmra.mxu0 %v4771_v22 }
  0x8b   :  { %4612 = vmatmul.mubr.bf16.gmra.mxu1 %v4772_v23  ;;  %4567 = vmatprep.mubr.bf16.mxu0 %v4773_v24 }
  0x8c   :  { %4615 = vmatprep.mubr.bf16.mxu1 %v4774_v25 }
  0x92   :  { %4568 = vmatmul.mubr.bf16.gmra.mxu0 %v4775_v26 }
  0x93   :  { %4616 = vmatmul.mubr.bf16.gmra.mxu1 %v4776_v27  ;;  %4571 = vmatprep.mubr.bf16.mxu0 %v4777_v28 }
  0x94   :  { %4619 = vmatprep.mubr.bf16.mxu1 %v4778_v29 }
  0x9a   :  { %4572 = vmatmul.mubr.bf16.gmra.mxu0 %v4779_v30 }
  0x9b   :  { %4620 = vmatmul.mubr.bf16.gmra.mxu1 %v4780_v31  ;;  %2828 = vmatprep.mubr.bf16.mxu0 %v3607_v44 }
  0x9c   :  { %2868 = vmatprep.mubr.bf16.mxu1 %v3609_v53 }
  0xe2   :  { %v4449_v32 = vpop.f32.mrf.mxu0 }
  0xe3   :  { %v4497_v34 = vpop.f32.mrf.mxu1  ;;  %v286_v36 = vadd.f32 %v4449_v32, %v5247_v33 }
  0xe4   :  { %v277_v35 = vpop.f32.mrf.mxu0  ;;  %v838_v38 = vadd.f32 %v4497_v34, %v5247_v33 }
  0xe5   :  { %v829_v37 = vpop.f32.mrf.mxu1  ;;  %v278_v41 = vadd.f32 %v5247_v33, %v277_v35  ;;  %v406_v49 = vmax.f32 %v286_v36, 0.0 }
  0xe6   :  { %v4450_v39 = vpop.f32.mrf.mxu0  ;;  %v830_v45 = vadd.f32 %v5247_v33, %v829_v37  ;;  %v958_v54 = vmax.f32 %v838_v38, 0.0 }
  0xe7   :  { %v289_v42 = vadd.f32 %v4450_v39, %v5247_v33  ;;  %v4498_v43 = vpop.f32.mrf.mxu1  ;;  %v404_v58 = vmax.f32 %v278_v41, 0.0 }
  0xe8   :  { %v841_v46 = vadd.f32 %v4498_v43, %v5247_v33  ;;  %v280_v47 = vpop.f32.mrf.mxu0  ;;  %v956_v62 = vmax.f32 %v830_v45, 0.0 }
  0xe9   :  { %v407_v50 = vmax.f32 %v289_v42, 0.0  ;;  %v281_v51 = vadd.f32 %v5247_v33, %v280_v47  ;;  %v832_v52 = vpop.f32.mrf.mxu1 }
  0xea   :  { %v959_v55 = vmax.f32 %v841_v46, 0.0  ;;  %v833_v56 = vadd.f32 %v5247_v33, %v832_v52  ;;  %v4453_v57 = vpop.f32.mrf.mxu0 }
  0xeb   :  { %v3845_v59 = vpack.c.bf16 %v407_v50, %v406_v49  ;;  %v405_v60 = vmax.f32 %v281_v51, 0.0  ;;  %v4501_v61 = vpop.f32.mrf.mxu1  ;;  %v302_v3 = vadd.f32 %v4453_v57, %v5247_v33 }
  0xec   :  { %v3925_v63 = vpack.c.bf16 %v959_v55, %v958_v54  ;;  %v957_v0 = vmax.f32 %v833_v56, 0.0  ;;  %v293_v1 = vpop.f32.mrf.mxu0  ;;  %v854_v6 = vadd.f32 %v4501_v61, %v5247_v33 }
  0xed   :  { %4157 = vst [vmem:[#allocation2 + $0x8] sm:$0xff] %v3845_v59   ;;  %v3840_v2 = vpack.c.bf16 %v405_v60, %v404_v58  ;;  %v845_v4 = vpop.f32.mrf.mxu1  ;;  %v294_v8 = vadd.f32 %v5247_v33, %v293_v1  ;;  %v410_v14 = vmax.f32 %v302_v3, 0.0 }
  0xee   :  { %4173 = vst [vmem:[#allocation2 + $0x88] sm:$0xff] %v3925_v63   ;;  %v3920_v5 = vpack.c.bf16 %v957_v0, %v956_v62  ;;  %v4454_v7 = vpop.f32.mrf.mxu0  ;;  %v846_v11 = vadd.f32 %v5247_v33, %v845_v4  ;;  %v962_v18 = vmax.f32 %v854_v6, 0.0 }
  0xef   :  { %3841 = vst [vmem:[#allocation2] sm:$0xff] %v3840_v2   ;;  %v305_v9 = vadd.f32 %v4454_v7, %v5247_v33  ;;  %v4502_v10 = vpop.f32.mrf.mxu1  ;;  %v408_v22 = vmax.f32 %v294_v8, 0.0 }
  0xf0   :  { %4172 = vst [vmem:[#allocation2 + $0x80] sm:$0xff] %v3920_v5   ;;  %v857_v12 = vadd.f32 %v4502_v10, %v5247_v33  ;;  %v296_v13 = vpop.f32.mrf.mxu0  ;;  %v960_v26 = vmax.f32 %v846_v11, 0.0 }
  0xf1   :  { %v411_v15 = vmax.f32 %v305_v9, 0.0  ;;  %v297_v16 = vadd.f32 %v5247_v33, %v296_v13  ;;  %v848_v17 = vpop.f32.mrf.mxu1 }
  0xf2   :  { %v963_v19 = vmax.f32 %v857_v12, 0.0  ;;  %v849_v20 = vadd.f32 %v5247_v33, %v848_v17  ;;  %v4457_v21 = vpop.f32.mrf.mxu0 }
  0xf3   :  { %v3855_v23 = vpack.c.bf16 %v411_v15, %v410_v14  ;;  %v409_v24 = vmax.f32 %v297_v16, 0.0  ;;  %v4505_v25 = vpop.f32.mrf.mxu1  ;;  %v318_v31 = vadd.f32 %v4457_v21, %v5247_v33 }
  0xf4   :  { %v3935_v27 = vpack.c.bf16 %v963_v19, %v962_v18  ;;  %v961_v28 = vmax.f32 %v849_v20, 0.0  ;;  %v309_v29 = vpop.f32.mrf.mxu0  ;;  %v870_v35 = vadd.f32 %v4505_v25, %v5247_v33 }
  0xf5   :  { %4159 = vst [vmem:[#allocation2 + $0x18] sm:$0xff] %v3855_v23   ;;  %v3850_v30 = vpack.c.bf16 %v409_v24, %v408_v22  ;;  %v861_v32 = vpop.f32.mrf.mxu1  ;;  %v310_v37 = vadd.f32 %v5247_v33, %v309_v29  ;;  %v414_v43 = vmax.f32 %v318_v31, 0.0 }
  0xf6   :  { %4175 = vst [vmem:[#allocation2 + $0x98] sm:$0xff] %v3935_v27   ;;  %v3930_v34 = vpack.c.bf16 %v961_v28, %v960_v26  ;;  %v4458_v36 = vpop.f32.mrf.mxu0  ;;  %v862_v40 = vadd.f32 %v5247_v33, %v861_v32  ;;  %v966_v47 = vmax.f32 %v870_v35, 0.0 }
  0xf7   :  { %4158 = vst [vmem:[#allocation2 + $0x10] sm:$0xff] %v3850_v30   ;;  %v321_v38 = vadd.f32 %v4458_v36, %v5247_v33  ;;  %v4506_v39 = vpop.f32.mrf.mxu1  ;;  %v412_v51 = vmax.f32 %v310_v37, 0.0 }
  0xf8   :  { %4174 = vst [vmem:[#allocation2 + $0x90] sm:$0xff] %v3930_v34   ;;  %v873_v41 = vadd.f32 %v4506_v39, %v5247_v33  ;;  %v312_v42 = vpop.f32.mrf.mxu0  ;;  %v964_v55 = vmax.f32 %v862_v40, 0.0 }
  0xf9   :  { %v415_v44 = vmax.f32 %v321_v38, 0.0  ;;  %v313_v45 = vadd.f32 %v5247_v33, %v312_v42  ;;  %v864_v46 = vpop.f32.mrf.mxu1 }
  0xfa   :  { %v967_v48 = vmax.f32 %v873_v41, 0.0  ;;  %v865_v49 = vadd.f32 %v5247_v33, %v864_v46  ;;  %v4461_v50 = vpop.f32.mrf.mxu0 }
  0xfb   :  { %v3865_v52 = vpack.c.bf16 %v415_v44, %v414_v43  ;;  %v413_v53 = vmax.f32 %v313_v45, 0.0  ;;  %v4509_v54 = vpop.f32.mrf.mxu1  ;;  %v334_v60 = vadd.f32 %v4461_v50, %v5247_v33 }
  0xfc   :  { %v3945_v56 = vpack.c.bf16 %v967_v48, %v966_v47  ;;  %v965_v57 = vmax.f32 %v865_v49, 0.0  ;;  %v325_v58 = vpop.f32.mrf.mxu0  ;;  %v886_v63 = vadd.f32 %v4509_v54, %v5247_v33 }
  0xfd   :  { %4161 = vst [vmem:[#allocation2 + $0x28] sm:$0xff] %v3865_v52   ;;  %v3860_v59 = vpack.c.bf16 %v413_v53, %v412_v51  ;;  %v877_v61 = vpop.f32.mrf.mxu1  ;;  %v326_v1 = vadd.f32 %v5247_v33, %v325_v58  ;;  %v418_v7 = vmax.f32 %v334_v60, 0.0 }
  0xfe   :  { %4177 = vst [vmem:[#allocation2 + $0xa8] sm:$0xff] %v3945_v56   ;;  %v3940_v62 = vpack.c.bf16 %v965_v57, %v964_v55  ;;  %v4462_v0 = vpop.f32.mrf.mxu0  ;;  %v878_v4 = vadd.f32 %v5247_v33, %v877_v61  ;;  %v970_v11 = vmax.f32 %v886_v63, 0.0 }
  0xff   :  { %4160 = vst [vmem:[#allocation2 + $0x20] sm:$0xff] %v3860_v59   ;;  %v337_v2 = vadd.f32 %v4462_v0, %v5247_v33  ;;  %v4510_v3 = vpop.f32.mrf.mxu1  ;;  %v416_v15 = vmax.f32 %v326_v1, 0.0 }
 0x100   :  { %4176 = vst [vmem:[#allocation2 + $0xa0] sm:$0xff] %v3940_v62   ;;  %v889_v5 = vadd.f32 %v4510_v3, %v5247_v33  ;;  %v328_v6 = vpop.f32.mrf.mxu0  ;;  %v968_v19 = vmax.f32 %v878_v4, 0.0 }
 0x101   :  { %v419_v8 = vmax.f32 %v337_v2, 0.0  ;;  %v329_v9 = vadd.f32 %v5247_v33, %v328_v6  ;;  %v880_v10 = vpop.f32.mrf.mxu1 }
 0x102   :  { %v971_v12 = vmax.f32 %v889_v5, 0.0  ;;  %v881_v13 = vadd.f32 %v5247_v33, %v880_v10  ;;  %v4465_v14 = vpop.f32.mrf.mxu0 }
 0x103   :  { %v3875_v16 = vpack.c.bf16 %v419_v8, %v418_v7  ;;  %v417_v17 = vmax.f32 %v329_v9, 0.0  ;;  %v4513_v18 = vpop.f32.mrf.mxu1  ;;  %v350_v24 = vadd.f32 %v4465_v14, %v5247_v33 }
 0x104   :  { %v3955_v20 = vpack.c.bf16 %v971_v12, %v970_v11  ;;  %v969_v21 = vmax.f32 %v881_v13, 0.0  ;;  %v341_v22 = vpop.f32.mrf.mxu0  ;;  %v902_v27 = vadd.f32 %v4513_v18, %v5247_v33 }
 0x105   :  { %4163 = vst [vmem:[#allocation2 + $0x38] sm:$0xff] %v3875_v16   ;;  %v3870_v23 = vpack.c.bf16 %v417_v17, %v416_v15  ;;  %v893_v25 = vpop.f32.mrf.mxu1  ;;  %v342_v29 = vadd.f32 %v5247_v33, %v341_v22  ;;  %v422_v36 = vmax.f32 %v350_v24, 0.0 }
 0x106   :  { %4179 = vst [vmem:[#allocation2 + $0xb8] sm:$0xff] %v3955_v20   ;;  %v3950_v26 = vpack.c.bf16 %v969_v21, %v968_v19  ;;  %v4466_v28 = vpop.f32.mrf.mxu0  ;;  %v894_v32 = vadd.f32 %v5247_v33, %v893_v25  ;;  %v974_v40 = vmax.f32 %v902_v27, 0.0 }
 0x107   :  { %4162 = vst [vmem:[#allocation2 + $0x30] sm:$0xff] %v3870_v23   ;;  %v353_v30 = vadd.f32 %v4466_v28, %v5247_v33  ;;  %v4514_v31 = vpop.f32.mrf.mxu1  ;;  %v420_v44 = vmax.f32 %v342_v29, 0.0 }
 0x108   :  { %4178 = vst [vmem:[#allocation2 + $0xb0] sm:$0xff] %v3950_v26   ;;  %v905_v34 = vadd.f32 %v4514_v31, %v5247_v33  ;;  %v344_v35 = vpop.f32.mrf.mxu0  ;;  %v972_v48 = vmax.f32 %v894_v32, 0.0 }
 0x109   :  { %v423_v37 = vmax.f32 %v353_v30, 0.0  ;;  %v345_v38 = vadd.f32 %v5247_v33, %v344_v35  ;;  %v896_v39 = vpop.f32.mrf.mxu1 }
 0x10a   :  { %v975_v41 = vmax.f32 %v905_v34, 0.0  ;;  %v897_v42 = vadd.f32 %v5247_v33, %v896_v39  ;;  %v4469_v43 = vpop.f32.mrf.mxu0 }
 0x10b   :  { %v3885_v45 = vpack.c.bf16 %v423_v37, %v422_v36  ;;  %v421_v46 = vmax.f32 %v345_v38, 0.0  ;;  %v4517_v47 = vpop.f32.mrf.mxu1  ;;  %v366_v53 = vadd.f32 %v4469_v43, %v5247_v33 }
 0x10c   :  { %v3965_v49 = vpack.c.bf16 %v975_v41, %v974_v40  ;;  %v973_v50 = vmax.f32 %v897_v42, 0.0  ;;  %v357_v51 = vpop.f32.mrf.mxu0  ;;  %v918_v56 = vadd.f32 %v4517_v47, %v5247_v33 }
 0x10d   :  { %4165 = vst [vmem:[#allocation2 + $0x48] sm:$0xff] %v3885_v45   ;;  %v3880_v52 = vpack.c.bf16 %v421_v46, %v420_v44  ;;  %v909_v54 = vpop.f32.mrf.mxu1  ;;  %v358_v58 = vadd.f32 %v5247_v33, %v357_v51  ;;  %v426_v0 = vmax.f32 %v366_v53, 0.0 }
 0x10e   :  { %4181 = vst [vmem:[#allocation2 + $0xc8] sm:$0xff] %v3965_v49   ;;  %v3960_v55 = vpack.c.bf16 %v973_v50, %v972_v48  ;;  %v4470_v57 = vpop.f32.mrf.mxu0  ;;  %v910_v61 = vadd.f32 %v5247_v33, %v909_v54  ;;  %v978_v4 = vmax.f32 %v918_v56, 0.0 }
 0x10f   :  { %4164 = vst [vmem:[#allocation2 + $0x40] sm:$0xff] %v3880_v52   ;;  %v369_v59 = vadd.f32 %v4470_v57, %v5247_v33  ;;  %v4518_v60 = vpop.f32.mrf.mxu1  ;;  %v424_v8 = vmax.f32 %v358_v58, 0.0 }
 0x110   :  { %4180 = vst [vmem:[#allocation2 + $0xc0] sm:$0xff] %v3960_v55   ;;  %v921_v62 = vadd.f32 %v4518_v60, %v5247_v33  ;;  %v360_v63 = vpop.f32.mrf.mxu0  ;;  %v976_v12 = vmax.f32 %v910_v61, 0.0 }
 0x111   :  { %v427_v1 = vmax.f32 %v369_v59, 0.0  ;;  %v361_v2 = vadd.f32 %v5247_v33, %v360_v63  ;;  %v912_v3 = vpop.f32.mrf.mxu1 }
 0x112   :  { %v979_v5 = vmax.f32 %v921_v62, 0.0  ;;  %v913_v6 = vadd.f32 %v5247_v33, %v912_v3  ;;  %v4473_v7 = vpop.f32.mrf.mxu0 }
 0x113   :  { %v3895_v9 = vpack.c.bf16 %v427_v1, %v426_v0  ;;  %v425_v10 = vmax.f32 %v361_v2, 0.0  ;;  %v4521_v11 = vpop.f32.mrf.mxu1  ;;  %v382_v17 = vadd.f32 %v4473_v7, %v5247_v33 }
 0x114   :  { %v3975_v13 = vpack.c.bf16 %v979_v5, %v978_v4  ;;  %v977_v14 = vmax.f32 %v913_v6, 0.0  ;;  %v373_v15 = vpop.f32.mrf.mxu0  ;;  %v934_v20 = vadd.f32 %v4521_v11, %v5247_v33 }
 0x115   :  { %4167 = vst [vmem:[#allocation2 + $0x58] sm:$0xff] %v3895_v9   ;;  %v3890_v16 = vpack.c.bf16 %v425_v10, %v424_v8  ;;  %v925_v18 = vpop.f32.mrf.mxu1  ;;  %v374_v22 = vadd.f32 %v5247_v33, %v373_v15  ;;  %v430_v28 = vmax.f32 %v382_v17, 0.0 }
 0x116   :  { %4183 = vst [vmem:[#allocation2 + $0xd8] sm:$0xff] %v3975_v13   ;;  %v3970_v19 = vpack.c.bf16 %v977_v14, %v976_v12  ;;  %v4474_v21 = vpop.f32.mrf.mxu0  ;;  %v926_v25 = vadd.f32 %v5247_v33, %v925_v18  ;;  %v982_v32 = vmax.f32 %v934_v20, 0.0 }
 0x117   :  { %4166 = vst [vmem:[#allocation2 + $0x50] sm:$0xff] %v3890_v16   ;;  %v385_v23 = vadd.f32 %v4474_v21, %v5247_v33  ;;  %v4522_v24 = vpop.f32.mrf.mxu1  ;;  %v428_v37 = vmax.f32 %v374_v22, 0.0 }
 0x118   :  { %4182 = vst [vmem:[#allocation2 + $0xd0] sm:$0xff] %v3970_v19   ;;  %v937_v26 = vadd.f32 %v4522_v24, %v5247_v33  ;;  %v376_v27 = vpop.f32.mrf.mxu0  ;;  %v980_v41 = vmax.f32 %v926_v25, 0.0 }
 0x119   :  { %v431_v29 = vmax.f32 %v385_v23, 0.0  ;;  %v377_v30 = vadd.f32 %v5247_v33, %v376_v27  ;;  %v928_v31 = vpop.f32.mrf.mxu1 }
 0x11a   :  { %v983_v34 = vmax.f32 %v937_v26, 0.0  ;;  %v929_v35 = vadd.f32 %v5247_v33, %v928_v31  ;;  %v4477_v36 = vpop.f32.mrf.mxu0 }
 0x11b   :  { %v3905_v38 = vpack.c.bf16 %v431_v29, %v430_v28  ;;  %v429_v39 = vmax.f32 %v377_v30, 0.0  ;;  %v4525_v40 = vpop.f32.mrf.mxu1  ;;  %v398_v46 = vadd.f32 %v4477_v36, %v5247_v33 }
 0x11c   :  { %v3985_v42 = vpack.c.bf16 %v983_v34, %v982_v32  ;;  %v981_v43 = vmax.f32 %v929_v35, 0.0  ;;  %v389_v44 = vpop.f32.mrf.mxu0  ;;  %v950_v49 = vadd.f32 %v4525_v40, %v5247_v33  ;;  %v4783_v35 = vld [vmem:[#allocation2 + $0x38] sm:$0xff]  }
 0x11d   :  { %4169 = vst [vmem:[#allocation2 + $0x68] sm:$0xff] %v3905_v38   ;;  %v3900_v45 = vpack.c.bf16 %v429_v39, %v428_v37  ;;  %v941_v47 = vpop.f32.mrf.mxu1  ;;  %v390_v51 = vadd.f32 %v5247_v33, %v389_v44  ;;  %v434_v57 = vmax.f32 %v398_v46, 0.0  ;;  %v4784_v40 = vld [vmem:[#allocation2 + $0xb8] sm:$0xff]  }
 0x11e   :  { %4185 = vst [vmem:[#allocation2 + $0xe8] sm:$0xff] %v3985_v42   ;;  %v3980_v48 = vpack.c.bf16 %v981_v43, %v980_v41  ;;  %v4478_v50 = vpop.f32.mrf.mxu0  ;;  %v942_v54 = vadd.f32 %v5247_v33, %v941_v47  ;;  %v986_v61 = vmax.f32 %v950_v49, 0.0 }
 0x11f   :  { %4168 = vst [vmem:[#allocation2 + $0x60] sm:$0xff] %v3900_v45   ;;  %v401_v52 = vadd.f32 %v4478_v50, %v5247_v33  ;;  %v4526_v53 = vpop.f32.mrf.mxu1  ;;  %v432_v1 = vmax.f32 %v390_v51, 0.0 }
 0x120   :  { %4184 = vst [vmem:[#allocation2 + $0xe0] sm:$0xff] %v3980_v48   ;;  %v953_v55 = vadd.f32 %v4526_v53, %v5247_v33  ;;  %v392_v56 = vpop.f32.mrf.mxu0  ;;  %v984_v5 = vmax.f32 %v942_v54, 0.0 }
 0x121   :  { %v435_v58 = vmax.f32 %v401_v52, 0.0  ;;  %v393_v59 = vadd.f32 %v5247_v33, %v392_v56  ;;  %v944_v60 = vpop.f32.mrf.mxu1 }
 0x122   :  { %v987_v62 = vmax.f32 %v953_v55, 0.0  ;;  %v945_v63 = vadd.f32 %v5247_v33, %v944_v60  ;;  %v4545_v0 = vpop.f32.mrf.mxu0  ;;  %v4787_v60 = vld [vmem:[#allocation2 + $0x30] sm:$0xff]  }
 0x123   :  { %v3915_v2 = vpack.c.bf16 %v435_v58, %v434_v57  ;;  %v433_v3 = vmax.f32 %v393_v59, 0.0  ;;  %v4593_v4 = vpop.f32.mrf.mxu1  ;;  %v1390_v10 = vadd.f32 %v4545_v0, %v5247_v33 }
 0x124   :  { %v3995_v6 = vpack.c.bf16 %v987_v62, %v986_v61  ;;  %v985_v7 = vmax.f32 %v945_v63, 0.0  ;;  %v1381_v8 = vpop.f32.mrf.mxu0  ;;  %v1942_v13 = vadd.f32 %v4593_v4, %v5247_v33 }
 0x125   :  { %4171 = vst [vmem:[#allocation2 + $0x78] sm:$0xff] %v3915_v2   ;;  %v3910_v9 = vpack.c.bf16 %v433_v3, %v432_v1  ;;  %v1933_v11 = vpop.f32.mrf.mxu1  ;;  %v1382_v15 = vadd.f32 %v5247_v33, %v1381_v8  ;;  %v1510_v21 = vmax.f32 %v1390_v10, 0.0  ;;  %v4788_v1 = vld [vmem:[#allocation2 + $0xb0] sm:$0xff]   ;;  %v4789_v2 = vld [vmem:[#allocation2 + $0x68] sm:$0xff]  }
 0x126   :  { %4187 = vst [vmem:[#allocation2 + $0xf8] sm:$0xff] %v3995_v6   ;;  %v3990_v12 = vpack.c.bf16 %v985_v7, %v984_v5  ;;  %v4546_v14 = vpop.f32.mrf.mxu0  ;;  %v1934_v16 = vadd.f32 %v5247_v33, %v1933_v11  ;;  %v2062_v25 = vmax.f32 %v1942_v13, 0.0  ;;  %v4790_v7 = vld [vmem:[#allocation2 + $0xe8] sm:$0xff]  }
 0x127   :  { %4170 = vst [vmem:[#allocation2 + $0x70] sm:$0xff] %v3910_v9   ;;  %v1393_v17 = vadd.f32 %v4546_v14, %v5247_v33  ;;  %v4594_v18 = vpop.f32.mrf.mxu1  ;;  %v1508_v29 = vmax.f32 %v1382_v15, 0.0  ;;  %v4791_v8 = vld [vmem:[#allocation2 + $0x28] sm:$0xff]  }
 0x128   :  { %4186 = vst [vmem:[#allocation2 + $0xf0] sm:$0xff] %v3990_v12   ;;  %v1945_v19 = vadd.f32 %v4594_v18, %v5247_v33  ;;  %v1384_v20 = vpop.f32.mrf.mxu0  ;;  %v2060_v30 = vmax.f32 %v1934_v16, 0.0  ;;  %v4792_v16 = vld [vmem:[#allocation2 + $0xa8] sm:$0xff]  }
 0x129   :  { %v1511_v22 = vmax.f32 %v1393_v17, 0.0  ;;  %v1385_v23 = vadd.f32 %v5247_v33, %v1384_v20  ;;  %v1936_v24 = vpop.f32.mrf.mxu1  ;;  %v4793_v20 = vld [vmem:[#allocation2 + $0x60] sm:$0xff]  }
 0x12a   :  { %v2063_v26 = vmax.f32 %v1945_v19, 0.0  ;;  %v1937_v27 = vadd.f32 %v5247_v33, %v1936_v24  ;;  %v4549_v28 = vpop.f32.mrf.mxu0  ;;  %v4794_v24 = vld [vmem:[#allocation2 + $0xe0] sm:$0xff]  }
 0x12b   :  { %v4005_v31 = vpack.c.bf16 %v1511_v22, %v1510_v21  ;;  %v1509_v32 = vmax.f32 %v1385_v23, 0.0  ;;  %v4597_v34 = vpop.f32.mrf.mxu1  ;;  %v1406_v42 = vadd.f32 %v4549_v28, %v5247_v33 }
 0x12c   :  { %v4085_v36 = vpack.c.bf16 %v2063_v26, %v2062_v25  ;;  %v2061_v37 = vmax.f32 %v1937_v27, 0.0  ;;  %v1397_v38 = vpop.f32.mrf.mxu0  ;;  %v4781_v39 = vld [vmem:[#allocation2 + $0x78] sm:$0xff]   ;;  %v1958_v46 = vadd.f32 %v4597_v34, %v5247_v33 }
 0x12d   :  { %4189 = vst [vmem:[#allocation2 + $0x108] sm:$0xff] %v4005_v31   ;;  %v4000_v41 = vpack.c.bf16 %v1509_v32, %v1508_v29  ;;  %v1949_v43 = vpop.f32.mrf.mxu1  ;;  %v4782_v44 = vld [vmem:[#allocation2 + $0xf8] sm:$0xff]   ;;  %4316 = vmatprep.subr.bf16.mxu0 %v4781_v39  ;;  %v1398_v49 = vadd.f32 %v5247_v33, %v1397_v38  ;;  %v1514_v56 = vmax.f32 %v1406_v42, 0.0  ;;  %v4795_v32 = vld [vmem:[#allocation2 + $0x20] sm:$0xff]  }
 0x12e   :  { %4205 = vst [vmem:[#allocation2 + $0x188] sm:$0xff] %v4085_v36   ;;  %v4080_v45 = vpack.c.bf16 %v2061_v37, %v2060_v30  ;;  %v4550_v47 = vpop.f32.mrf.mxu0  ;;  %v4785_v48 = vld [vmem:[#allocation2 + $0x70] sm:$0xff]   ;;  %4338 = vmatprep.subr.bf16.mxu1 %v4782_v44  ;;  %4317 = vmatpush3.bf16.msra.mxu0 %v4783_v35  ;;  %v1950_v53 = vadd.f32 %v5247_v33, %v1949_v43  ;;  %v2066_v61 = vmax.f32 %v1958_v46, 0.0  ;;  %v4796_v38 = vld [vmem:[#allocation2 + $0xa0] sm:$0xff]   ;;  %v4797_v39 = vld [vmem:[#allocation2 + $0x58] sm:$0xff]  }
 0x12f   :  { %4188 = vst [vmem:[#allocation2 + $0x100] sm:$0xff] %v4000_v41   ;;  %v1409_v50 = vadd.f32 %v4550_v47, %v5247_v33  ;;  %v4598_v51 = vpop.f32.mrf.mxu1  ;;  %v4786_v52 = vld [vmem:[#allocation2 + $0xf0] sm:$0xff]   ;;  %4339 = vmatpush3.bf16.msra.mxu1 %v4784_v40  ;;  %4318 = vmatprep.subr.bf16.mxu0 %v4785_v48  ;;  %v1512_v3 = vmax.f32 %v1398_v49, 0.0  ;;  %v4798_v44 = vld [vmem:[#allocation2 + $0xd8] sm:$0xff]  }
 0x130   :  { %4204 = vst [vmem:[#allocation2 + $0x180] sm:$0xff] %v4080_v45   ;;  %v1961_v54 = vadd.f32 %v4598_v51, %v5247_v33  ;;  %v1400_v55 = vpop.f32.mrf.mxu0  ;;  %4340 = vmatprep.subr.bf16.mxu1 %v4786_v52  ;;  %v2064_v9 = vmax.f32 %v1950_v53, 0.0  ;;  %v4799_v45 = vld [vmem:[#allocation2 + $0x18] sm:$0xff]  }
 0x131   :  { %v1515_v57 = vmax.f32 %v1409_v50, 0.0  ;;  %v1401_v58 = vadd.f32 %v5247_v33, %v1400_v55  ;;  %v1952_v59 = vpop.f32.mrf.mxu1  ;;  %v4800_v53 = vld [vmem:[#allocation2 + $0x98] sm:$0xff]  }
 0x132   :  { %v2067_v62 = vmax.f32 %v1961_v54, 0.0  ;;  %v1953_v63 = vadd.f32 %v5247_v33, %v1952_v59  ;;  %v4553_v0 = vpop.f32.mrf.mxu0  ;;  %4319 = vmatpush3.bf16.msra.mxu0 %v4787_v60 }
 0x133   :  { %v4015_v4 = vpack.c.bf16 %v1515_v57, %v1514_v56  ;;  %v1513_v5 = vmax.f32 %v1401_v58, 0.0  ;;  %v4601_v6 = vpop.f32.mrf.mxu1  ;;  %4341 = vmatpush3.bf16.msra.mxu1 %v4788_v1  ;;  %4320 = vmatprep.subr.bf16.mxu0 %v4789_v2  ;;  %v1422_v14 = vadd.f32 %v4553_v0, %v5247_v33  ;;  %v4801_v57 = vld [vmem:[#allocation2 + $0x50] sm:$0xff]  }
 0x134   :  { %v4095_v10 = vpack.c.bf16 %v2067_v62, %v2066_v61  ;;  %v2065_v11 = vmax.f32 %v1953_v63, 0.0  ;;  %v1413_v12 = vpop.f32.mrf.mxu0  ;;  %4342 = vmatprep.subr.bf16.mxu1 %v4790_v7  ;;  %v1974_v18 = vadd.f32 %v4601_v6, %v5247_v33  ;;  %v4802_v61 = vld [vmem:[#allocation2 + $0xd0] sm:$0xff]  }
 0x135   :  { %4191 = vst [vmem:[#allocation2 + $0x118] sm:$0xff] %v4015_v4   ;;  %v4010_v13 = vpack.c.bf16 %v1513_v5, %v1512_v3  ;;  %v1965_v15 = vpop.f32.mrf.mxu1  ;;  %v1414_v21 = vadd.f32 %v5247_v33, %v1413_v12  ;;  %v1518_v28 = vmax.f32 %v1422_v14, 0.0  ;;  %v4803_v5 = vld [vmem:[#allocation2 + $0x10] sm:$0xff]  }
 0x136   :  { %4207 = vst [vmem:[#allocation2 + $0x198] sm:$0xff] %v4095_v10   ;;  %v4090_v17 = vpack.c.bf16 %v2065_v11, %v2064_v9  ;;  %v4554_v19 = vpop.f32.mrf.mxu0  ;;  %4321 = vmatpush3.bf16.msra.mxu0 %v4791_v8  ;;  %v1966_v25 = vadd.f32 %v5247_v33, %v1965_v15  ;;  %v2070_v34 = vmax.f32 %v1974_v18, 0.0  ;;  %v4804_v10 = vld [vmem:[#allocation2 + $0x90] sm:$0xff]   ;;  %v4805_v11 = vld [vmem:[#allocation2 + $0x48] sm:$0xff]  }
 0x137   :  { %4190 = vst [vmem:[#allocation2 + $0x110] sm:$0xff] %v4010_v13   ;;  %v1425_v22 = vadd.f32 %v4554_v19, %v5247_v33  ;;  %v4602_v23 = vpop.f32.mrf.mxu1  ;;  %4343 = vmatpush3.bf16.msra.mxu1 %v4792_v16  ;;  %4322 = vmatprep.subr.bf16.mxu0 %v4793_v20  ;;  %v1516_v40 = vmax.f32 %v1414_v21, 0.0  ;;  %v4806_v16 = vld [vmem:[#allocation2 + $0xc8] sm:$0xff]  }
 0x138   :  { %4206 = vst [vmem:[#allocation2 + $0x190] sm:$0xff] %v4090_v17   ;;  %v1977_v26 = vadd.f32 %v4602_v23, %v5247_v33  ;;  %v1416_v27 = vpop.f32.mrf.mxu0  ;;  %4344 = vmatprep.subr.bf16.mxu1 %v4794_v24  ;;  %v2068_v46 = vmax.f32 %v1966_v25, 0.0  ;;  %v4807_v17 = vld [vmem:[#allocation2 + $0x8] sm:$0xff]  }
 0x139   :  { %v1519_v29 = vmax.f32 %v1425_v22, 0.0  ;;  %v1417_v30 = vadd.f32 %v5247_v33, %v1416_v27  ;;  %v1968_v31 = vpop.f32.mrf.mxu1  ;;  %v4808_v25 = vld [vmem:[#allocation2 + $0x88] sm:$0xff]  }
 0x13a   :  { %v2071_v35 = vmax.f32 %v1977_v26, 0.0  ;;  %v1969_v36 = vadd.f32 %v5247_v33, %v1968_v31  ;;  %v4557_v37 = vpop.f32.mrf.mxu0  ;;  %4323 = vmatpush3.bf16.msra.mxu0 %v4795_v32 }
 0x13b   :  { %v4025_v41 = vpack.c.bf16 %v1519_v29, %v1518_v28  ;;  %v1517_v42 = vmax.f32 %v1417_v30, 0.0  ;;  %v4605_v43 = vpop.f32.mrf.mxu1  ;;  %4345 = vmatpush3.bf16.msra.mxu1 %v4796_v38  ;;  %4324 = vmatprep.subr.bf16.mxu0 %v4797_v39  ;;  %v1438_v51 = vadd.f32 %v4557_v37, %v5247_v33  ;;  %v4809_v29 = vld [vmem:[#allocation2 + $0x40] sm:$0xff]   ;;  %v5365_v38 = vld [vmem:[%s5540_s3 + $0x10] sm:$0xff] }
 0x13c   :  { %v4105_v47 = vpack.c.bf16 %v2071_v35, %v2070_v34  ;;  %v2069_v48 = vmax.f32 %v1969_v36, 0.0  ;;  %v1429_v49 = vpop.f32.mrf.mxu0  ;;  %4346 = vmatprep.subr.bf16.mxu1 %v4798_v44  ;;  %v1990_v55 = vadd.f32 %v4605_v43, %v5247_v33  ;;  %v4810_v34 = vld [vmem:[#allocation2 + $0xc0] sm:$0xff]  }
 0x13d   :  { %4193 = vst [vmem:[#allocation2 + $0x128] sm:$0xff] %v4025_v41   ;;  %v4020_v50 = vpack.c.bf16 %v1517_v42, %v1516_v40  ;;  %v1981_v52 = vpop.f32.mrf.mxu1  ;;  %v1430_v58 = vadd.f32 %v5247_v33, %v1429_v49  ;;  %v1522_v1 = vmax.f32 %v1438_v51, 0.0  ;;  %v4811_v43 = vld [vmem:[#allocation2] sm:$0xff]  }
 0x13e   :  { %4209 = vst [vmem:[#allocation2 + $0x1a8] sm:$0xff] %v4105_v47   ;;  %v4100_v54 = vpack.c.bf16 %v2069_v48, %v2068_v46  ;;  %v4558_v56 = vpop.f32.mrf.mxu0  ;;  %4325 = vmatpush3.bf16.msra.mxu0 %v4799_v45  ;;  %v1982_v62 = vadd.f32 %v5247_v33, %v1981_v52  ;;  %v2074_v6 = vmax.f32 %v1990_v55, 0.0  ;;  %v4882_v44 = vld [vmem:[%s5540_s3] sm:$0xff]  ;;  %v5374_v46 = vld [vmem:[%s5540_s3 + $0x18] sm:$0xff]  ;;  %v4883_v52 = vld [vmem:[%s5540_s3 + $0x8] sm:$0xff] }
 0x13f   :  { %4192 = vst [vmem:[#allocation2 + $0x120] sm:$0xff] %v4020_v50   ;;  %v1441_v59 = vadd.f32 %v4558_v56, %v5247_v33  ;;  %v4606_v60 = vpop.f32.mrf.mxu1  ;;  %4347 = vmatpush3.bf16.msra.mxu1 %v4800_v53  ;;  %4326 = vmatprep.subr.bf16.mxu0 %v4801_v57  ;;  %v1520_v12 = vmax.f32 %v1430_v58, 0.0  ;;  %v3606_v45 = vcombine.low %v4882_v44, %v4882_v44  ;;  %v4812_v51 = vld [vmem:[#allocation2 + $0x80] sm:$0xff]  }
 0x140   :  { %4208 = vst [vmem:[#allocation2 + $0x1a0] sm:$0xff] %v4100_v54   ;;  %v1993_v63 = vadd.f32 %v4606_v60, %v5247_v33  ;;  %v1432_v0 = vpop.f32.mrf.mxu0  ;;  %4348 = vmatprep.subr.bf16.mxu1 %v4802_v61  ;;  %v2072_v18 = vmax.f32 %v1982_v62, 0.0  ;;  %v3608_v53 = vcombine.low %v4883_v52, %v4883_v52  ;;  %v3611_v58 = vcombine.high %v5365_v38, %v5365_v38 }
 0x141   :  { %v1523_v2 = vmax.f32 %v1441_v59, 0.0  ;;  %v1433_v3 = vadd.f32 %v5247_v33, %v1432_v0  ;;  %v1984_v4 = vpop.f32.mrf.mxu1 }
 0x142   :  { %v2075_v7 = vmax.f32 %v1993_v63, 0.0  ;;  %v1985_v8 = vadd.f32 %v5247_v33, %v1984_v4  ;;  %v4561_v9 = vpop.f32.mrf.mxu0  ;;  %4327 = vmatpush3.bf16.msra.mxu0 %v4803_v5  ;;  %v5354_v33 = vld [vmem:[%s5539_s2] ss:$0 sm:$0xff]  ;;  %v3613_v63 = vcombine.high %v5374_v46, %v5374_v46 }
 0x143   :  { %v4035_v13 = vpack.c.bf16 %v1523_v2, %v1522_v1  ;;  %v1521_v14 = vmax.f32 %v1433_v3, 0.0  ;;  %v4609_v15 = vpop.f32.mrf.mxu1  ;;  %4349 = vmatpush3.bf16.msra.mxu1 %v4804_v10  ;;  %4328 = vmatprep.subr.bf16.mxu0 %v4805_v11  ;;  %v1454_v23 = vadd.f32 %v5354_v33, %v4561_v9 }
 0x144   :  { %v4115_v19 = vpack.c.bf16 %v2075_v7, %v2074_v6  ;;  %v2073_v20 = vmax.f32 %v1985_v8, 0.0  ;;  %v1445_v21 = vpop.f32.mrf.mxu0  ;;  %4350 = vmatprep.subr.bf16.mxu1 %v4806_v16  ;;  %v2006_v27 = vadd.f32 %v5354_v33, %v4609_v15 }
 0x145   :  { %4195 = vst [vmem:[#allocation2 + $0x138] sm:$0xff] %v4035_v13   ;;  %v4030_v22 = vpack.c.bf16 %v1521_v14, %v1520_v12  ;;  %v1997_v24 = vpop.f32.mrf.mxu1  ;;  %v1446_v30 = vadd.f32 %v5354_v33, %v1445_v21  ;;  %v1526_v39 = vmax.f32 %v1454_v23, 0.0 }
 0x146   :  { %4211 = vst [vmem:[#allocation2 + $0x1b8] sm:$0xff] %v4115_v19   ;;  %v4110_v26 = vpack.c.bf16 %v2073_v20, %v2072_v18  ;;  %v4562_v28 = vpop.f32.mrf.mxu0  ;;  %4329 = vmatpush3.bf16.msra.mxu0 %v4807_v17  ;;  %v1998_v35 = vadd.f32 %v5354_v33, %v1997_v24  ;;  %v2078_v47 = vmax.f32 %v2006_v27, 0.0 }
 0x147   :  { %4194 = vst [vmem:[#allocation2 + $0x130] sm:$0xff] %v4030_v22   ;;  %v1457_v31 = vadd.f32 %v5354_v33, %v4562_v28  ;;  %v4610_v32 = vpop.f32.mrf.mxu1  ;;  %4351 = vmatpush3.bf16.msra.mxu1 %v4808_v25  ;;  %4330 = vmatprep.subr.bf16.mxu0 %v4809_v29  ;;  %v1524_v54 = vmax.f32 %v1446_v30, 0.0 }
 0x148   :  { %4210 = vst [vmem:[#allocation2 + $0x1b0] sm:$0xff] %v4110_v26   ;;  %v2009_v36 = vadd.f32 %v5354_v33, %v4610_v32  ;;  %v1448_v37 = vpop.f32.mrf.mxu0  ;;  %4352 = vmatprep.subr.bf16.mxu1 %v4810_v34  ;;  %v2076_v59 = vmax.f32 %v1998_v35, 0.0 }
 0x149   :  { %v1527_v40 = vmax.f32 %v1457_v31, 0.0  ;;  %v1449_v41 = vadd.f32 %v5354_v33, %v1448_v37  ;;  %v2000_v42 = vpop.f32.mrf.mxu1 }
 0x14a   :  { %v2079_v48 = vmax.f32 %v2009_v36, 0.0  ;;  %v2001_v49 = vadd.f32 %v5354_v33, %v2000_v42  ;;  %v4565_v50 = vpop.f32.mrf.mxu0  ;;  %4331 = vmatpush3.bf16.msra.mxu0 %v4811_v43 }
 0x14b   :  { %v4045_v55 = vpack.c.bf16 %v1527_v40, %v1526_v39  ;;  %v1525_v56 = vmax.f32 %v1449_v41, 0.0  ;;  %v4613_v57 = vpop.f32.mrf.mxu1  ;;  %4353 = vmatpush3.bf16.msra.mxu1 %v4812_v51  ;;  %v1470_v1 = vadd.f32 %v5354_v33, %v4565_v50 }
 0x14c   :  { %v4125_v60 = vpack.c.bf16 %v2079_v48, %v2078_v47  ;;  %v2077_v61 = vmax.f32 %v2001_v49, 0.0  ;;  %v1461_v62 = vpop.f32.mrf.mxu0  ;;  %v2022_v4 = vadd.f32 %v5354_v33, %v4613_v57 }
 0x14d   :  { %4197 = vst [vmem:[#allocation2 + $0x148] sm:$0xff] %v4045_v55   ;;  %v4040_v0 = vpack.c.bf16 %v1525_v56, %v1524_v54  ;;  %v2013_v2 = vpop.f32.mrf.mxu1  ;;  %2829 = vmatmul.mubr.bf16.vlgmr.msra.gmra.mxu0 %v3606_v45  ;;  %v1462_v6 = vadd.f32 %v5354_v33, %v1461_v62  ;;  %v1530_v12 = vmax.f32 %v1470_v1, 0.0 }
 0x14e   :  { %4213 = vst [vmem:[#allocation2 + $0x1c8] sm:$0xff] %v4125_v60   ;;  %v4120_v3 = vpack.c.bf16 %v2077_v61, %v2076_v59  ;;  %v4566_v5 = vpop.f32.mrf.mxu0  ;;  %2869 = vmatmul.mubr.bf16.vlgmr.msra.gmra.mxu1 %v3608_v53  ;;  %2908 = vmatprep.mubr.bf16.mxu0 %v3611_v58  ;;  %v2014_v9 = vadd.f32 %v5354_v33, %v2013_v2  ;;  %v2082_v16 = vmax.f32 %v2022_v4, 0.0 }
 0x14f   :  { %4196 = vst [vmem:[#allocation2 + $0x140] sm:$0xff] %v4040_v0   ;;  %v1473_v7 = vadd.f32 %v5354_v33, %v4566_v5  ;;  %v4614_v8 = vpop.f32.mrf.mxu1  ;;  %2948 = vmatprep.mubr.bf16.mxu1 %v3613_v63  ;;  %v1528_v20 = vmax.f32 %v1462_v6, 0.0 }
 0x150   :  { %4212 = vst [vmem:[#allocation2 + $0x1c0] sm:$0xff] %v4120_v3   ;;  %v2025_v10 = vadd.f32 %v5354_v33, %v4614_v8  ;;  %v1464_v11 = vpop.f32.mrf.mxu0  ;;  %v2080_v24 = vmax.f32 %v2014_v9, 0.0 }
 0x151   :  { %v1531_v13 = vmax.f32 %v1473_v7, 0.0  ;;  %v1465_v14 = vadd.f32 %v5354_v33, %v1464_v11  ;;  %v2016_v15 = vpop.f32.mrf.mxu1 }
 0x152   :  { %v2083_v17 = vmax.f32 %v2025_v10, 0.0  ;;  %v2017_v18 = vadd.f32 %v5354_v33, %v2016_v15  ;;  %v4569_v19 = vpop.f32.mrf.mxu0 }
 0x153   :  { %v4055_v21 = vpack.c.bf16 %v1531_v13, %v1530_v12  ;;  %v1529_v22 = vmax.f32 %v1465_v14, 0.0  ;;  %v4617_v23 = vpop.f32.mrf.mxu1  ;;  %v1486_v29 = vadd.f32 %v5354_v33, %v4569_v19 }
 0x154   :  { %v4135_v25 = vpack.c.bf16 %v2083_v17, %v2082_v16  ;;  %v2081_v26 = vmax.f32 %v2017_v18, 0.0  ;;  %v1477_v27 = vpop.f32.mrf.mxu0  ;;  %v2038_v32 = vadd.f32 %v5354_v33, %v4617_v23 }
 0x155   :  { %4199 = vst [vmem:[#allocation2 + $0x158] sm:$0xff] %v4055_v21   ;;  %v4050_v28 = vpack.c.bf16 %v1529_v22, %v1528_v20  ;;  %v2029_v30 = vpop.f32.mrf.mxu1  ;;  %v1478_v35 = vadd.f32 %v5354_v33, %v1477_v27  ;;  %v1534_v42 = vmax.f32 %v1486_v29, 0.0  ;;  %v4819_v22 = vld [vmem:[#allocation2 + $0x138] sm:$0xff]   ;;  %v4823_v27 = vld [vmem:[#allocation2 + $0x130] sm:$0xff]  }
 0x156   :  { %4215 = vst [vmem:[#allocation2 + $0x1d8] sm:$0xff] %v4135_v25   ;;  %v4130_v31 = vpack.c.bf16 %v2081_v26, %v2080_v24  ;;  %v4570_v34 = vpop.f32.mrf.mxu0  ;;  %v2030_v39 = vadd.f32 %v5354_v33, %v2029_v30  ;;  %v2086_v47 = vmax.f32 %v2038_v32, 0.0  ;;  %v4820_v24 = vld [vmem:[#allocation2 + $0x1b8] sm:$0xff]   ;;  %v4828_v32 = vld [vmem:[#allocation2 + $0x1a8] sm:$0xff]  }
 0x157   :  { %4198 = vst [vmem:[#allocation2 + $0x150] sm:$0xff] %v4050_v28   ;;  %v1489_v36 = vadd.f32 %v5354_v33, %v4570_v34  ;;  %v4618_v37 = vpop.f32.mrf.mxu1  ;;  %v1532_v51 = vmax.f32 %v1478_v35, 0.0  ;;  %v4824_v28 = vld [vmem:[#allocation2 + $0x1b0] sm:$0xff]  }
 0x158   :  { %4214 = vst [vmem:[#allocation2 + $0x1d0] sm:$0xff] %v4130_v31   ;;  %v2041_v40 = vadd.f32 %v5354_v33, %v4618_v37  ;;  %v1480_v41 = vpop.f32.mrf.mxu0  ;;  %v2084_v55 = vmax.f32 %v2030_v39, 0.0  ;;  %v4827_v31 = vld [vmem:[#allocation2 + $0x128] sm:$0xff]   ;;  %v4832_v37 = vld [vmem:[#allocation2 + $0x1a0] sm:$0xff]  }
 0x159   :  { %v1535_v43 = vmax.f32 %v1489_v36, 0.0  ;;  %v1481_v44 = vadd.f32 %v5354_v33, %v1480_v41  ;;  %v2032_v45 = vpop.f32.mrf.mxu1  ;;  %v4831_v36 = vld [vmem:[#allocation2 + $0x120] sm:$0xff]   ;;  %v4835_v41 = vld [vmem:[#allocation2 + $0x118] sm:$0xff]  }
 0x15a   :  { %v2087_v48 = vmax.f32 %v2041_v40, 0.0  ;;  %v2033_v49 = vadd.f32 %v5354_v33, %v2032_v45  ;;  %v4573_v50 = vpop.f32.mrf.mxu0  ;;  %v4839_v45 = vld [vmem:[#allocation2 + $0x110] sm:$0xff]  }
 0x15b   :  { %v4065_v52 = vpack.c.bf16 %v1535_v43, %v1534_v42  ;;  %v1533_v53 = vmax.f32 %v1481_v44, 0.0  ;;  %v4621_v54 = vpop.f32.mrf.mxu1  ;;  %v1502_v60 = vadd.f32 %v5354_v33, %v4573_v50  ;;  %v4836_v42 = vld [vmem:[#allocation2 + $0x198] sm:$0xff]   ;;  %v4843_v50 = vld [vmem:[#allocation2 + $0x108] sm:$0xff]  }
 0x15c   :  { %v4145_v56 = vpack.c.bf16 %v2087_v48, %v2086_v47  ;;  %v2085_v57 = vmax.f32 %v2033_v49, 0.0  ;;  %v1493_v58 = vpop.f32.mrf.mxu0  ;;  %v2054_v63 = vadd.f32 %v5354_v33, %v4621_v54  ;;  %v4833_v39 = vld [vmem:[#allocation2 + $0x158] sm:$0xff]   ;;  %v4840_v47 = vld [vmem:[#allocation2 + $0x190] sm:$0xff]   ;;  %v4841_v48 = vld [vmem:[#allocation2 + $0x148] sm:$0xff]  }
 0x15d   :  { %4201 = vst [vmem:[#allocation2 + $0x168] sm:$0xff] %v4065_v52   ;;  %v4060_v59 = vpack.c.bf16 %v1533_v53, %v1532_v51  ;;  %v2045_v61 = vpop.f32.mrf.mxu1  ;;  %v1494_v1 = vadd.f32 %v5354_v33, %v1493_v58  ;;  %v1538_v7 = vmax.f32 %v1502_v60, 0.0  ;;  %v4834_v40 = vld [vmem:[#allocation2 + $0x1d8] sm:$0xff]   ;;  %v4842_v49 = vld [vmem:[#allocation2 + $0x1c8] sm:$0xff]   ;;  %v4845_v52 = vld [vmem:[#allocation2 + $0x140] sm:$0xff]   ;;  %v4884_v58 = vmov 0.0  }
 0x15e   :  { %4217 = vst [vmem:[#allocation2 + $0x1e8] sm:$0xff] %v4145_v56   ;;  %v4140_v62 = vpack.c.bf16 %v2085_v57, %v2084_v55  ;;  %v4574_v0 = vpop.f32.mrf.mxu0  ;;  %v2046_v4 = vadd.f32 %v5354_v33, %v2045_v61  ;;  %v2090_v11 = vmax.f32 %v2054_v63, 0.0  ;;  %v4837_v43 = vld [vmem:[#allocation2 + $0x150] sm:$0xff]   ;;  %v4844_v51 = vld [vmem:[#allocation2 + $0x188] sm:$0xff]   ;;  %v4846_v53 = vld [vmem:[#allocation2 + $0x1c0] sm:$0xff]   ;;  %v3610_v56 = vcombine.low %v5365_v38, %v5365_v38 }
 0x15f   :  { %4200 = vst [vmem:[#allocation2 + $0x160] sm:$0xff] %v4060_v59   ;;  %v1505_v2 = vadd.f32 %v5354_v33, %v4574_v0  ;;  %v4622_v3 = vpop.f32.mrf.mxu1  ;;  %v1536_v14 = vmax.f32 %v1494_v1, 0.0  ;;  %v4838_v44 = vld [vmem:[#allocation2 + $0x1d0] sm:$0xff]   ;;  %v4847_v54 = vld [vmem:[#allocation2 + $0x100] sm:$0xff]   ;;  %v3612_v57 = vcombine.low %v5374_v46, %v5374_v46  ;;  %v4853_v59 = vld [vmem:[%s5541_s4 + $0x38] sm:$0xff]  }
 0x160   :  { %4216 = vst [vmem:[#allocation2 + $0x1e0] sm:$0xff] %v4140_v62   ;;  %v2057_v5 = vadd.f32 %v5354_v33, %v4622_v3  ;;  %v1496_v6 = vpop.f32.mrf.mxu0  ;;  %v2088_v17 = vmax.f32 %v2046_v4, 0.0  ;;  %v4848_v55 = vld [vmem:[#allocation2 + $0x180] sm:$0xff]   ;;  %v4854_v38 = vld [vmem:[%s5541_s4 + $0x30] sm:$0xff]   ;;  %v4855_v46 = vld [vmem:[%s5541_s4 + $0x28] sm:$0xff]  }
 0x161   :  { %v1539_v8 = vmax.f32 %v1505_v2, 0.0  ;;  %v1497_v9 = vadd.f32 %v5354_v33, %v1496_v6  ;;  %v2048_v10 = vpop.f32.mrf.mxu1  ;;  %v4856_v60 = vld [vmem:[%s5541_s4 + $0x20] sm:$0xff]   ;;  %v4857_v61 = vld [vmem:[%s5541_s4 + $0x18] sm:$0xff]   ;;  %v4858_v62 = vld [vmem:[%s5541_s4 + $0x10] sm:$0xff]  }
 0x162   :  { %v2091_v12 = vmax.f32 %v2057_v5, 0.0  ;;  %v2049_v13 = vadd.f32 %v5354_v33, %v2048_v10  ;;  %v4859_v63 = vld [vmem:[%s5541_s4 + $0x8] sm:$0xff]   ;;  %v4860_v0 = vld [vmem:[%s5541_s4] sm:$0xff]   ;;  %v4861_v1 = vld [vmem:[%s5542_s6 + $0x38] sm:$0xff]  }
 0x163   :  { %v4075_v15 = vpack.c.bf16 %v1539_v8, %v1538_v7  ;;  %v1537_v16 = vmax.f32 %v1497_v9, 0.0  ;;  %v4862_v2 = vld [vmem:[%s5542_s6 + $0x30] sm:$0xff]   ;;  %v4863_v3 = vld [vmem:[%s5542_s6 + $0x28] sm:$0xff]   ;;  %v4864_v4 = vld [vmem:[%s5542_s6 + $0x20] sm:$0xff]  }
 0x164   :  { %v4155_v18 = vpack.c.bf16 %v2091_v12, %v2090_v11  ;;  %v2089_v19 = vmax.f32 %v2049_v13, 0.0  ;;  %v4825_v29 = vld [vmem:[#allocation2 + $0x168] sm:$0xff]   ;;  %v4865_v5 = vld [vmem:[%s5542_s6 + $0x18] sm:$0xff]   ;;  %v4866_v6 = vld [vmem:[%s5542_s6 + $0x10] sm:$0xff]  }
 0x165   :  { %4203 = vst [vmem:[#allocation2 + $0x178] sm:$0xff] %v4075_v15   ;;  %v4070_v20 = vpack.c.bf16 %v1537_v16, %v1536_v14  ;;  %v4826_v30 = vld [vmem:[#allocation2 + $0x1e8] sm:$0xff]  }
 0x166   :  { %4219 = vst [vmem:[#allocation2 + $0x1f8] sm:$0xff] %v4155_v18   ;;  %v4150_v21 = vpack.c.bf16 %v2089_v19, %v2088_v17  ;;  %v4829_v34 = vld [vmem:[#allocation2 + $0x160] sm:$0xff]   ;;  %v4867_v7 = vld [vmem:[%s5542_s6 + $0x8] sm:$0xff]  }
 0x167   :  { %4202 = vst [vmem:[#allocation2 + $0x170] sm:$0xff] %v4070_v20   ;;  %v4830_v35 = vld [vmem:[#allocation2 + $0x1e0] sm:$0xff]  }
 0x168   :  { %4218 = vst [vmem:[#allocation2 + $0x1f0] sm:$0xff] %v4150_v21  }
 0x16c   :  { %v4817_v23 = vld [vmem:[#allocation2 + $0x178] sm:$0xff]  }
 0x16d   :  { %v4818_v25 = vld [vmem:[#allocation2 + $0x1f8] sm:$0xff]   ;;  %4360 = vmatprep.subr.bf16.mxu0 %v4817_v23 }
 0x16e   :  { %v4821_v26 = vld [vmem:[#allocation2 + $0x170] sm:$0xff]   ;;  %4382 = vmatprep.subr.bf16.mxu1 %v4818_v25  ;;  %4361 = vmatpush3.bf16.msra.mxu0 %v4819_v22 }
 0x16f   :  { %v4822_v33 = vld [vmem:[#allocation2 + $0x1f0] sm:$0xff]   ;;  %4383 = vmatpush3.bf16.msra.mxu1 %v4820_v24  ;;  %4362 = vmatprep.subr.bf16.mxu0 %v4821_v26 }
 0x170   :  { %4384 = vmatprep.subr.bf16.mxu1 %v4822_v33 }
 0x172   :  { %4363 = vmatpush3.bf16.msra.mxu0 %v4823_v27 }
 0x173   :  { %4385 = vmatpush3.bf16.msra.mxu1 %v4824_v28  ;;  %4364 = vmatprep.subr.bf16.mxu0 %v4825_v29 }
 0x174   :  { %4386 = vmatprep.subr.bf16.mxu1 %v4826_v30 }
 0x176   :  { %4365 = vmatpush3.bf16.msra.mxu0 %v4827_v31 }
 0x177   :  { %4387 = vmatpush3.bf16.msra.mxu1 %v4828_v32  ;;  %4366 = vmatprep.subr.bf16.mxu0 %v4829_v34  ;;  %v4868_v32 = vld [vmem:[%s5542_s6] sm:$0xff]  }
 0x178   :  { %4388 = vmatprep.subr.bf16.mxu1 %v4830_v35  ;;  %v3678_v34 = vld [vmem:[%s5543_s5] ss:$0 sm:$0xff] }
 0x17a   :  { %4367 = vmatpush3.bf16.msra.mxu0 %v4831_v36 }
 0x17b   :  { %4389 = vmatpush3.bf16.msra.mxu1 %v4832_v37  ;;  %4368 = vmatprep.subr.bf16.mxu0 %v4833_v39 }
 0x17c   :  { %4390 = vmatprep.subr.bf16.mxu1 %v4834_v40 }
 0x17e   :  { %4369 = vmatpush3.bf16.msra.mxu0 %v4835_v41 }
 0x17f   :  { %4391 = vmatpush3.bf16.msra.mxu1 %v4836_v42  ;;  %4370 = vmatprep.subr.bf16.mxu0 %v4837_v43  ;;  %v4869_v42 = vld [vmem:[%s5545_s10 + $0x38] sm:$0xff]   ;;  %v4870_v43 = vld [vmem:[%s5545_s10 + $0x30] sm:$0xff]  }
 0x180   :  { %4392 = vmatprep.subr.bf16.mxu1 %v4838_v44  ;;  %v4871_v44 = vld [vmem:[%s5545_s10 + $0x28] sm:$0xff]  }
 0x182   :  { %4371 = vmatpush3.bf16.msra.mxu0 %v4839_v45  ;;  %v4872_v45 = vld [vmem:[%s5545_s10 + $0x20] sm:$0xff]  }
 0x183   :  { %4393 = vmatpush3.bf16.msra.mxu1 %v4840_v47  ;;  %4372 = vmatprep.subr.bf16.mxu0 %v4841_v48  ;;  %v4873_v47 = vld [vmem:[%s5545_s10 + $0x18] sm:$0xff]   ;;  %v4874_v48 = vld [vmem:[%s5545_s10 + $0x10] sm:$0xff]  }
 0x184   :  { %4394 = vmatprep.subr.bf16.mxu1 %v4842_v49  ;;  %v4875_v49 = vld [vmem:[%s5545_s10 + $0x8] sm:$0xff]  }
 0x186   :  { %4373 = vmatpush3.bf16.msra.mxu0 %v4843_v50  ;;  %v4876_v50 = vld [vmem:[%s5545_s10] sm:$0xff]  }
 0x187   :  { %4395 = vmatpush3.bf16.msra.mxu1 %v4844_v51  ;;  %4374 = vmatprep.subr.bf16.mxu0 %v4845_v52  ;;  %v3182_v51 = vlaneseq }
 0x188   :  { %4396 = vmatprep.subr.bf16.mxu1 %v4846_v53  ;;  %v3687_v53 = vld [vmem:[%s5546_s7] ss:$0 sm:$0xff] }
 0x189   :  { %v3183_v52 = vshrl.u32 %v3182_v51, 7 }
 0x18a   :  { %4375 = vmatpush3.bf16.msra.mxu0 %v4847_v54 }
 0x18b   :  { %4397 = vmatpush3.bf16.msra.mxu1 %v4848_v55  ;;  %4623 = vmatprep.subr.bf16.mxu0 %v4884_v58  ;;  %vm3212_vm1 = vcmp.ge.s32.totalorder %v3183_v52, 2  ;;  %vm3213_vm2 = vcmp.lt.s32.totalorder %v3183_v52, 4  ;;  %vm3185_vm3 = vcmp.lt.s32.totalorder %v3183_v52, 2 }
 0x18c   :  { %4643 = vmatprep.subr.bf16.mxu1 %v4884_v58  ;;  %vm3214_vm4 = vmand %vm3212_vm1, %vm3213_vm2  ;;  %v3696_v55 = vsel %vm3185_vm3, 1.0, %v4884_v58 }
 0x18d   :  { %2909 = vmatmul.mubr.bf16.vlgmr.msra.gmra.mxu0 %v3610_v56  ;;  %v3697_v56 = vsel %vm3214_vm4, 1.0, %v4884_v58 }
 0x18e   :  { %2949 = vmatmul.mubr.bf16.vlgmr.msra.gmra.mxu1 %v3612_v57  ;;  %4624 = vmatpush3.bf16.msra.mxu0 %v4853_v59 }
 0x18f   :  { %4625 = vmatprep.subr.bf16.mxu0 %v4884_v58  ;;  %4639 = vmatprep.mubr.msk.bf16.mxu0 %vm4885_vm0, %v4884_v58 }
 0x190   :  { %4659 = vmatprep.mubr.msk.bf16.mxu1 %vm4885_vm0, %v4884_v58  ;;  %4644 = vmatpush3.bf16.msra.mxu1 %v4861_v1 }
 0x191   :  { %4645 = vmatprep.subr.bf16.mxu1 %v4884_v58 }
 0x192   :  { %4626 = vmatpush3.bf16.msra.mxu0 %v4854_v38 }
 0x193   :  { %4627 = vmatprep.subr.bf16.mxu0 %v4884_v58 }
 0x194   :  { %4646 = vmatpush3.bf16.msra.mxu1 %v4862_v2 }
 0x195   :  { %4647 = vmatprep.subr.bf16.mxu1 %v4884_v58 }
 0x196   :  { %4628 = vmatpush3.bf16.msra.mxu0 %v4855_v46 }
 0x197   :  { %4629 = vmatprep.subr.bf16.mxu0 %v4884_v58 }
 0x198   :  { %4648 = vmatpush3.bf16.msra.mxu1 %v4863_v3 }
 0x199   :  { %4649 = vmatprep.subr.bf16.mxu1 %v4884_v58 }
 0x19a   :  { %4630 = vmatpush3.bf16.msra.mxu0 %v4856_v60 }
 0x19b   :  { %4631 = vmatprep.subr.bf16.mxu0 %v4884_v58 }
 0x19c   :  { %4650 = vmatpush3.bf16.msra.mxu1 %v4864_v4 }
 0x19d   :  { %4651 = vmatprep.subr.bf16.mxu1 %v4884_v58 }
 0x19e   :  { %4632 = vmatpush3.bf16.msra.mxu0 %v4857_v61 }
 0x19f   :  { %4633 = vmatprep.subr.bf16.mxu0 %v4884_v58 }
 0x1a0   :  { %4652 = vmatpush3.bf16.msra.mxu1 %v4865_v5 }
 0x1a1   :  { %4653 = vmatprep.subr.bf16.mxu1 %v4884_v58 }
 0x1a2   :  { %4634 = vmatpush3.bf16.msra.mxu0 %v4858_v62 }
 0x1a3   :  { %4635 = vmatprep.subr.bf16.mxu0 %v4884_v58 }
 0x1a4   :  { %4654 = vmatpush3.bf16.msra.mxu1 %v4866_v6 }
 0x1a5   :  { %4655 = vmatprep.subr.bf16.mxu1 %v4884_v58 }
 0x1a6   :  { %4636 = vmatpush3.bf16.msra.mxu0 %v4859_v63 }
 0x1a7   :  { %4637 = vmatprep.subr.bf16.mxu0 %v4884_v58 }
 0x1a8   :  { %4656 = vmatpush3.bf16.msra.mxu1 %v4867_v7 }
 0x1a9   :  { %4657 = vmatprep.subr.bf16.mxu1 %v4884_v58 }
 0x1aa   :  { %4638 = vmatpush3.bf16.msra.mxu0 %v4860_v0 }
 0x1ab   :  { %4663 = vmatprep.subr.bf16.mxu0 %v4884_v58 }
 0x1ac   :  { %4658 = vmatpush3.bf16.msra.mxu1 %v4868_v32 }
 0x20d   :  { %v4332_v8 = vpop.f32.mrf.mxu0 }
 0x20e   :  { %v4354_v9 = vpop.f32.mrf.mxu1 }
 0x20f   :  { %v4333_v10 = vpop.f32.mrf.mxu0 }
 0x210   :  { %v4355_v11 = vpop.f32.mrf.mxu1  ;;  %v4334_v16 = vadd.f32 %v4333_v10, %v4332_v8 }
 0x211   :  { %v4335_v12 = vpop.f32.mrf.mxu0  ;;  %v4356_v17 = vadd.f32 %v4355_v11, %v4354_v9 }
 0x212   :  { %v4357_v13 = vpop.f32.mrf.mxu1 }
 0x213   :  { %v4336_v14 = vpop.f32.mrf.mxu0  ;;  %v2871_v21 = vadd.f32 %v4356_v17, %v4334_v16 }
 0x214   :  { %v4358_v15 = vpop.f32.mrf.mxu1 }
 0x24d   :  { %v4376_v18 = vpop.f32.mrf.mxu0 }
 0x24e   :  { %v4398_v19 = vpop.f32.mrf.mxu1 }
 0x24f   :  { %v4377_v20 = vpop.f32.mrf.mxu0 }
 0x250   :  { %v4378_v22 = vadd.f32 %v4377_v20, %v4376_v18  ;;  %v4399_v23 = vpop.f32.mrf.mxu1 }
 0x251   :  { %v4379_v24 = vpop.f32.mrf.mxu0  ;;  %v4400_v26 = vadd.f32 %v4399_v23, %v4398_v19 }
 0x252   :  { %v2911_v25 = vadd.f32 %v4378_v22, %v2871_v21  ;;  %v4401_v33 = vpop.f32.mrf.mxu1 }
 0x253   :  { %v4380_v27 = vpop.f32.mrf.mxu0 }
 0x254   :  { %v2951_v28 = vadd.f32 %v4400_v26, %v2911_v25  ;;  %v4402_v29 = vpop.f32.mrf.mxu1 }
 0x256   :  { %v2956_v30 = vmul.f32 0.00390625, %v2951_v28 }
 0x258   :  { %v2957_v31 = vpack.c.bf16 %v2956_v30, %v2956_v30 }
 0x25a   :  { %4640 = vmatmul.mubr.bf16.vlgmr.msra.gmra.mxu0 %v2957_v31 }
 0x25b   :  { %4679 = vmatprep.mubr.msk.bf16.mxu0 %vm4885_vm0, %v4884_v58  ;;  %4664 = vmatpush3.bf16.msra.mxu0 %v4869_v42  ;;  %v3699_v42 = vld [vmem:[%s5548_s9] ss:$0 sm:$0xff] }
 0x25c   :  { %4665 = vmatprep.subr.bf16.mxu0 %v4884_v58 }
 0x25f   :  { %4666 = vmatpush3.bf16.msra.mxu0 %v4870_v43 }
 0x260   :  { %4667 = vmatprep.subr.bf16.mxu0 %v4884_v58 }
 0x263   :  { %4668 = vmatpush3.bf16.msra.mxu0 %v4871_v44 }
 0x264   :  { %4669 = vmatprep.subr.bf16.mxu0 %v4884_v58 }
 0x267   :  { %4670 = vmatpush3.bf16.msra.mxu0 %v4872_v45 }
 0x268   :  { %4671 = vmatprep.subr.bf16.mxu0 %v4884_v58 }
 0x26b   :  { %4672 = vmatpush3.bf16.msra.mxu0 %v4873_v47 }
 0x26c   :  { %4673 = vmatprep.subr.bf16.mxu0 %v4884_v58 }
 0x26f   :  { %4674 = vmatpush3.bf16.msra.mxu0 %v4874_v48  ;;  %v3700_v48 = vld [vmem:[%s5549_s11] ss:$0 sm:$0xff] }
 0x270   :  { %4675 = vmatprep.subr.bf16.mxu0 %v4884_v58 }
 0x273   :  { %4676 = vmatpush3.bf16.msra.mxu0 %v4875_v49 }
 0x274   :  { %4677 = vmatprep.subr.bf16.mxu0 %v4884_v58 }
 0x277   :  { %4678 = vmatpush3.bf16.msra.mxu0 %v4876_v50 }
 0x31a   :  { %v3063_v35 = vpop.f32.mrf.mxu0 }
 0x31b   :  { %v3064_v36 = vadd.f32 %v3678_v34, %v3063_v35 }
 0x31c   :  { %v4641_v37 = vpop.f32.mrf.mxu0 }
 0x31d   :  { %3069 = vst [vmem:[%s5544_s13] sm:$0xff] %v3064_v36  ;;  %v3070_v39 = vpack.c.bf16 %v3064_v36, %v3064_v36 }
 0x31e   :  { %v3066_v40 = vpop.f32.mrf.mxu0 }
 0x31f   :  { %4660 = vmatmul.mubr.bf16.vlgmr.msra.gmra.mxu1 %v3070_v39  ;;  %v3698_v40 = vld [vmem:[%s5547_s8] ss:$0 sm:$0xff] }
 0x320   :  { %v4642_v41 = vpop.f32.mrf.mxu0 }
 0x3df   :  { %v3176_v54 = vpop.f32.mrf.mxu1 }
 0x3e0   :  { %v3177_v57 = vadd.f32 %v3687_v53, %v3176_v54 }
 0x3e1   :  { %v4661_v59 = vpop.f32.mrf.mxu1 }
 0x3e2   :  { %v3189_v38 = vmul.f32 %v3696_v55, %v3177_v57  ;;  %v3217_v46 = vmul.f32 %v3697_v56, %v3177_v57 }
 0x3e3   :  { %v3179_v60 = vpop.f32.mrf.mxu1 }
 0x3e4   :  { %v3190_v61 = vrot.slane %v3189_v38, 4  ;;  %v3218_v62 = vrot.slane %v3217_v46, 4 }
 0x3e5   :  { %v4662_v63 = vpop.f32.mrf.mxu1 }
 0x3e6   :  { %v3191_v0 = vadd.f32 %v3190_v61, %v3189_v38  ;;  %v3219_v1 = vadd.f32 %v3218_v62, %v3217_v46 }
 0x3e8   :  { %v3192_v2 = vrot.slane %v3191_v0, 2  ;;  %v3220_v3 = vrot.slane %v3219_v1, 2 }
 0x3ea   :  { %v3193_v4 = vadd.f32 %v3192_v2, %v3191_v0  ;;  %v3221_v5 = vadd.f32 %v3220_v3, %v3219_v1 }
 0x3ec   :  { %v3194_v6 = vrot.slane %v3193_v4, 1  ;;  %v3222_v7 = vrot.slane %v3221_v5, 1 }
 0x3ee   :  { %v3195_v8 = vadd.f32 %v3194_v6, %v3193_v4  ;;  %v3223_v9 = vadd.f32 %v3222_v7, %v3221_v5 }
 0x3f0   :  { %v3196_v10 = vmul.f32 0.5, %v3195_v8  ;;  %v3224_v58 = vmul.f32 0.5, %v3223_v9 }
 0x3f2   :  { %v3197_v11 = vsub.f32 %v3177_v57, %v3196_v10  ;;  %v3225_v12 = vsub.f32 %v3177_v57, %v3224_v58 }
 0x3f4   :  { %v3198_v13 = vmul.f32 %v3197_v11, %v3197_v11  ;;  %v3226_v14 = vmul.f32 %v3225_v12, %v3225_v12 }
 0x3f6   :  { %v3199_v15 = vmul.f32 %v3696_v55, %v3198_v13  ;;  %v3227_v16 = vmul.f32 %v3697_v56, %v3226_v14 }
 0x3f8   :  { %v3200_v17 = vrot.slane %v3199_v15, 4  ;;  %v3228_v18 = vrot.slane %v3227_v16, 4 }
 0x3fa   :  { %v3201_v19 = vadd.f32 %v3200_v17, %v3199_v15  ;;  %v3229_v20 = vadd.f32 %v3228_v18, %v3227_v16 }
 0x3fc   :  { %v3202_v21 = vrot.slane %v3201_v19, 2  ;;  %v3230_v22 = vrot.slane %v3229_v20, 2 }
 0x3fe   :  { %v3203_v23 = vadd.f32 %v3202_v21, %v3201_v19  ;;  %v3231_v24 = vadd.f32 %v3230_v22, %v3229_v20 }
 0x400   :  { %v3204_v25 = vrot.slane %v3203_v23, 1  ;;  %v3232_v26 = vrot.slane %v3231_v24, 1 }
 0x402   :  { %v3205_v33 = vadd.f32 %v3204_v25, %v3203_v23  ;;  %v3233_v27 = vadd.f32 %v3232_v26, %v3231_v24 }
 0x404   :  { %v3206_v28 = vmul.f32 0.5, %v3205_v33  ;;  %v3234_v29 = vmul.f32 0.5, %v3233_v27 }
 0x406   :  { %v3207_v30 = vadd.f32 1e-05, %v3206_v28  ;;  %v3235_v31 = vadd.f32 1e-05, %v3234_v29 }
 0x408   :  { %4877 = vrsqrt.f32 %v3207_v30 }
 0x409   :  { %4879 = vrsqrt.f32 %v3235_v31 }
 0x415   :  { %v4878_v32 = vpop.eup %4877 }
 0x416   :  { %v4880_v34 = vpop.eup %4879  ;;  %v3209_v35 = vmul.f32 %v4878_v32, %v3197_v11 }
 0x417   :  { %v3237_v36 = vmul.f32 %v4880_v34, %v3225_v12 }
 0x418   :  { %v3210_v37 = vmul.f32 %v3696_v55, %v3209_v35 }
 0x419   :  { %v3238_v39 = vmul.f32 %v3697_v56, %v3237_v36 }
 0x41b   :  { %v3239_v41 = vadd.f32 %v3238_v39, %v3210_v37 }
 0x41d   :  { %v3247_v43 = vmul.f32 %v3698_v40, %v3239_v41 }
 0x41f   :  { %v3255_v44 = vadd.f32 %v3699_v42, %v3247_v43 }
 0x421   :  { %v3256_v45 = vmax.f32 %v3255_v44, 0.0 }
 0x423   :  { %v3257_v47 = vpack.c.bf16 %v3256_v45, %v3256_v45 }
 0x425   :  { %4680 = vmatmul.mubr.bf16.vlgmr.msra.gmra.mxu0 %v3257_v47 }
 0x4e5   :  { %v3363_v49 = vpop.f32.mrf.mxu0 }
 0x4e6   :  { %v3364_v50 = vadd.f32 %v3700_v48, %v3363_v49 }
 0x4e7   :  { %v4681_v51 = vpop.f32.mrf.mxu0 }
 0x4e8   :  { %3369 = vst [vmem:[%s5550_s12] sm:$0xff] %v3364_v50 }
 0x4e9   :  { %v3366_v52 = vpop.f32.mrf.mxu0 }
 0x4eb   :  { %v4682_v53 = vpop.f32.mrf.mxu0 }

</bundles_post_ra>
